<compile_context>
chip_gen: v7x
topology: tpu7x:2x2x1
jax: 0.10.0
libtpu: 0.0.40
codegen_flags: <defaults>
</compile_context>

<pallas_src>
from functools import partial

import jax
import jax.numpy as jnp
from jax.experimental import pallas as pl
from jax.experimental.pallas import tpu as pltpu


def _round_up(x, m):
    return ((x + m - 1) // m) * m


def _pick_tile_r(R, want=1024):
    """Row tile: multiple of 16, as large as possible, but small enough that
    the row grid keeps >= 2 steps (v7x megacore sharding)."""
    t = min(want, _round_up(max((R + 1) // 2, 16), 16))
    return max(16, t)


# ----------------------------------------------------------------------------
# Pallas kernels
# ----------------------------------------------------------------------------
def _fused_upsample_kernel(p1_ref, xp_ref, w1_ref, b1_ref, a_ref, w2b_ref,
                           b2b_ref, bx_ref, rr_ref, o_ref, *, group):
    """Fused mask path (conv1+PReLU -> 0.25*conv2, broadcast over C) +
    9-neighbor softmax + convex combination, at full lane width.

    p1_ref  : (T, 9*Cm)         guide patches (NHWC im2col), col = n*Cm + cm, bf16
    xp_ref  : (T, 9*C)          x patches,                   col = n*C  + c,  bf16
    w1_ref  : (9*Cm, 256)       mask_conv1 weight (HWIO rows), bf16
    b1_ref  : (1, 256)          mask_conv1 bias, f32
    a_ref   : (1, 1) SMEM       PReLU alpha (mask path)
    w2b_ref : (256, 9*up2*C)    0.25*mask_conv2 weight, broadcast over c, bf16
    b2b_ref : (1, 9*up2*C)      0.25*mask_conv2 bias,   broadcast over c, f32
    bx_ref  : (9*C, 9*up2*C)    0/1 matrix: broadcast x patches over up^2, bf16
    rr_ref  : (9*up2*C, up2*C)  0/1 matrix: sum over the 9 neighbors, bf16
    o_ref   : (T, up2*C)        output, col = (i*up + j)*C + c, f32
    group   : up2*C (static)
    """
    f32 = jnp.float32

    # mask_conv1 (3x3 conv as matmul) + PReLU               -> (T, 256)
    h = jnp.dot(p1_ref[...], w1_ref[...], preferred_element_type=f32)
    h = h + b1_ref[...]
    alpha = a_ref[0, 0]
    h = jnp.where(h >= 0.0, h, alpha * h)

    # mask_conv2 (1x1 conv); 0.25 and broadcast-over-c folded into w2b/b2b.
    # Logits in broadcast layout: col = n*group + u*C + c    -> (T, 9*group)
    m = jnp.dot(h.astype(jnp.bfloat16), w2b_ref[...], preferred_element_type=f32)
    m = m + b2b_ref[...]

    # per-(u, c) max over the 9 neighbor groups (columns already repeat over c)
    mx = m[:, 0:group]
    for n in range(1, 9):
        mx = jnp.maximum(mx, m[:, n * group:(n + 1) * group])
    mxb = jnp.concatenate([mx] * 9, axis=1)                 # (T, 9*group)
    e = jnp.exp(m - mxb)                                    # full-width EUP

    # broadcast x patches over the up^2 sub-pixels with a 0/1 matmul (MXU)
    xr = jnp.dot(xp_ref[...], bx_ref[...], preferred_element_type=f32)

    # numerator / denominator: one full-width multiply + two 0/1 reduce matmuls
    num = jnp.dot((e * xr).astype(jnp.bfloat16), rr_ref[...],
                  preferred_element_type=f32)               # (T, group)
    den = jnp.dot(e.astype(jnp.bfloat16), rr_ref[...],
                  preferred_element_type=f32)               # (T, group), >= 1
    o_ref[...] = num / den


def _conv_prelu_kernel(pf_ref, w_ref, b_ref, a_ref, o_ref):
    """Final conv-as-matmul: (T, K) @ (K, Cout) + bias, then PReLU."""
    acc = jnp.dot(pf_ref[...], w_ref[...], preferred_element_type=jnp.float32)
    acc = acc + b_ref[...]
    alpha = a_ref[0, 0]
    o_ref[...] = jnp.where(acc >= 0.0, acc, alpha * acc)


# ----------------------------------------------------------------------------
# Pallas wrappers (grid over flattened spatial rows, pipelined)
# ----------------------------------------------------------------------------
def fused_convex_upsample(p1, xp, w1_mat, b1, alpha, w2b, b2b, bx, rr,
                          *, C, up, tile_r=1024):
    R, K1 = p1.shape
    KX = xp.shape[1]
    group = up * up * C
    Nb = 9 * group

    t = _pick_tile_r(R, tile_r)
    Rp = _round_up(R, t)
    if Rp != R:
        p1 = jnp.pad(p1, ((0, Rp - R), (0, 0)))
        xp = jnp.pad(xp, ((0, Rp - R), (0, 0)))
    grid = (Rp // t,)

    cost = pl.CostEstimate(
        flops=2 * Rp * (K1 * 256 + 256 * Nb + KX * Nb + 2 * Nb * group)
              + 8 * Rp * Nb,
        transcendentals=Rp * Nb,
        bytes_accessed=2 * Rp * (K1 + KX) + 4 * Rp * group
                       + 2 * (K1 * 256 + 256 * Nb + KX * Nb + Nb * group)
                       + 4 * (256 + Nb),
    )

    kernel = partial(_fused_upsample_kernel, group=group)
    out = pl.pallas_call(
        kernel,
        out_shape=jax.ShapeDtypeStruct((Rp, group), jnp.float32),
        grid_spec=pltpu.PrefetchScalarGridSpec(
            num_scalar_prefetch=0,
            grid=grid,
            in_specs=[
                pl.BlockSpec((t, K1), lambda i: (i, 0)),            # guide patches
                pl.BlockSpec((t, KX), lambda i: (i, 0)),            # x patches
                pl.BlockSpec((K1, 256), lambda i: (0, 0)),          # w1
                pl.BlockSpec((1, 256), lambda i: (0, 0)),           # b1
                pl.BlockSpec(memory_space=pltpu.MemorySpace.SMEM),  # alpha
                pl.BlockSpec((256, Nb), lambda i: (0, 0)),          # w2 (fused)
                pl.BlockSpec((1, Nb), lambda i: (0, 0)),            # b2 (fused)
                pl.BlockSpec((KX, Nb), lambda i: (0, 0)),           # Bx broadcast
                pl.BlockSpec((Nb, group), lambda i: (0, 0)),        # R reduce
            ],
            out_specs=pl.BlockSpec((t, group), lambda i: (i, 0)),
        ),
        compiler_params=pltpu.CompilerParams(
            dimension_semantics=("parallel",),
            vmem_limit_bytes=32 * 1024 * 1024),
        cost_estimate=cost,
    )(p1, xp, w1_mat, b1.reshape(1, 256), alpha.reshape(1, 1),
      w2b, b2b.reshape(1, Nb), bx, rr)
    return out[:R]


def conv_matmul_prelu(patches, w_mat, bias, alpha, *, tile_r=1024):
    R, K = patches.shape
    N = w_mat.shape[1]

    t = _pick_tile_r(R, tile_r)
    Rp = _round_up(R, t)
    if Rp != R:
        patches = jnp.pad(patches, ((0, Rp - R), (0, 0)))
    grid = (Rp // t,)

    cost = pl.CostEstimate(
        flops=2 * Rp * K * N, transcendentals=0,
        bytes_accessed=2 * Rp * K + 4 * Rp * N + 2 * K * N + 4 * N)

    out = pl.pallas_call(
        _conv_prelu_kernel,
        out_shape=jax.ShapeDtypeStruct((Rp, N), jnp.float32),
        grid_spec=pltpu.PrefetchScalarGridSpec(
            num_scalar_prefetch=0,
            grid=grid,
            in_specs=[
                pl.BlockSpec((t, K), lambda i: (i, 0)),
                pl.BlockSpec((K, N), lambda i: (0, 0)),
                pl.BlockSpec((1, N), lambda i: (0, 0)),
                pl.BlockSpec(memory_space=pltpu.MemorySpace.SMEM),
            ],
            out_specs=pl.BlockSpec((t, N), lambda i: (i, 0)),   # unpadded C_out
        ),
        compiler_params=pltpu.CompilerParams(
            dimension_semantics=("parallel",),
            vmem_limit_bytes=32 * 1024 * 1024),
        cost_estimate=cost,
    )(patches, w_mat, bias.reshape(1, N), alpha.reshape(1, 1))
    return out[:R]


# ----------------------------------------------------------------------------
# JAX glue: NHWC im2col (neighbor-major patch columns, no post-transpose)
# ----------------------------------------------------------------------------
def im2col_nhwc(x_nhwc, k, stride, padding):
    """Patches of shape (B*Ho*Wo, k*k*C), col = n*C + c with n = kh*k + kw."""
    B, H, W, C = x_nhwc.shape
    xp = jnp.pad(x_nhwc, ((0, 0), (padding, padding), (padding, padding), (0, 0)))
    Ho = (H + 2 * padding - k) // stride + 1
    Wo = (W + 2 * padding - k) // stride + 1
    cols = [xp[:, kh:kh + stride * Ho:stride, kw:kw + stride * Wo:stride, :]
            for kh in range(k) for kw in range(k)]
    cols = jnp.stack(cols, axis=3)               # (B, Ho, Wo, k*k, C)
    return cols.reshape(B * Ho * Wo, k * k * C), Ho, Wo


# ----------------------------------------------------------------------------
# decoder forward (Pallas path)
# ----------------------------------------------------------------------------
def decoder_forward(x, guide, params, *, up, ksz, stride, padding, tile_r=1024):
    B, C, H, W = x.shape

    if up > 1:
        # space-to-depth of the guide, NHWC (same channel-block order as torch)
        g = guide.transpose(0, 2, 3, 1)
        mask_in = jnp.concatenate(
            [g[:, ::2, ::2, :], g[:, ::2, 1::2, :],
             g[:, 1::2, ::2, :], g[:, 1::2, 1::2, :]], axis=-1)

        p1, Hm, Wm = im2col_nhwc(mask_in, 3, 1, 1)                # (B*H*W, 9*4Cg)
        assert (Hm, Wm) == (H, W), (Hm, Wm, H, W)
        px, _, _ = im2col_nhwc(x.transpose(0, 2, 3, 1), 3, 1, 1)  # (B*H*W, 9*C)

        out_cols = fused_convex_upsample(
            p1.astype(jnp.bfloat16), px.astype(jnp.bfloat16),
            params["w1_mat"], params["b1"], params["a_mask"],
            params["w2b_mat"], params["b2b"], params["bx"], params["rr"],
            C=C, up=up, tile_r=tile_r)                            # (B*H*W, up^2*C)

        # cols (di, dj, c) -> NHWC upsampled image (B, up*H, up*W, C)
        up_nhwc = out_cols.reshape(B, H, W, up, up, C)
        up_nhwc = up_nhwc.transpose(0, 1, 3, 2, 4, 5).reshape(B, up * H, up * W, C)
        # TODO(synk): fold this transpose + the second im2col into in-kernel
        #             halo patch construction (review items 2 & 8).
    else:
        up_nhwc = x.transpose(0, 2, 3, 1)

    # --- final conv + PReLU (Pallas, unpadded C_out output columns) ---
    pf, Ho, Wo = im2col_nhwc(up_nhwc, ksz, stride, padding)
    of = conv_matmul_prelu(pf.astype(jnp.bfloat16), params["wc_mat"],
                           params["bc"], params["a_out"], tile_r=tile_r)
    Cout = of.shape[1]
    return of.reshape(B, Ho, Wo, Cout).transpose(0, 3, 1, 2)      # NCHW


# ----------------------------------------------------------------------------
# Pure-JAX reference (mirrors the PyTorch forward) for a sanity check
# ----------------------------------------------------------------------------
def _conv2d_ref(x, w, b, stride, padding):
    out = jax.lax.conv_general_dilated(
        x, w, (stride, stride), [(padding, padding), (padding, padding)],
        dimension_numbers=("NCHW", "OIHW", "NCHW"))
    return out + b.reshape(1, -1, 1, 1)


def _prelu(x, a):
    return jnp.where(x >= 0, x, a * x)


def decoder_reference(x, guide, P, *, up, ksz, stride, padding):
    B, C, H, W = x.shape
    mask_in = jnp.concatenate(
        [guide[:, :, ::2, ::2], guide[:, :, ::2, 1::2],
         guide[:, :, 1::2, ::2], guide[:, :, 1::2, 1::2]], axis=1)
    m = _conv2d_ref(mask_in, P["w1"], P["b1"], 1, 1)
    m = _prelu(m, P["a_mask"][0])
    m = _conv2d_ref(m, P["w2"], P["b2"], 1, 0)
    m = 0.25 * m
    m = m.reshape(B, 1, 9, up, up, H, W)
    m = jax.nn.softmax(m, axis=2)
    xpad = jnp.pad(x, ((0, 0), (0, 0), (1, 1), (1, 1)))
    patches = jnp.stack([xpad[:, :, kh:kh + H, kw:kw + W]
                         for kh in range(3) for kw in range(3)], axis=2)
    xu = patches.reshape(B, C, 9, 1, 1, H, W)
    s = jnp.sum(m * xu, axis=2)
    s = s.transpose(0, 1, 4, 2, 5, 3).reshape(B, C, up * H, up * W)
    out = _conv2d_ref(s, P["wc"], P["bc"], stride, padding)
    return _prelu(out, P["a_out"][0])


# ----------------------------------------------------------------------------
if __name__ == "__main__":
    # decoder(channels_in=4, channels_in_guide=4, channels_out=8,
    #         upsample_factor=2, kernel_size=3, stride=1, padding=1)
    B, C_in, Cg, C_out = 2, 4, 4, 8
    up, ksz, stride, pad = 2, 3, 1, 1
    H, W = 8, 8                       # x spatial; guide spatial is 2x
    up2 = up * up

    key = jax.random.PRNGKey(0)
    k1, k2, k3, k4, k5, k6, kx, kg = jax.random.split(key, 8)

    w1 = 0.05 * jax.random.normal(k1, (256, 4 * Cg, 3, 3), jnp.float32)
    b1 = 0.05 * jax.random.normal(k2, (256,), jnp.float32)
    w2 = 0.05 * jax.random.normal(k3, (up2 * 9, 256, 1, 1), jnp.float32)
    b2 = 0.05 * jax.random.normal(k4, (up2 * 9,), jnp.float32)
    wc = 0.10 * jax.random.normal(k5, (C_out, C_in, ksz, ksz), jnp.float32)
    bc = 0.10 * jax.random.normal(k6, (C_out,), jnp.float32)
    a_mask = jnp.full((1,), 0.25, jnp.float32)
    a_out = jnp.full((1,), 0.25, jnp.float32)

    group = up2 * C_in
    params = {
        # 4D weights (for the reference)
        "w1": w1, "b1": b1, "w2": w2, "b2": b2, "wc": wc, "bc": bc,
        "a_mask": a_mask, "a_out": a_out,
        # kernel-layout weights: HWIO rows to match NHWC neighbor-major patches,
        # bf16 for the MXU, 0.25 and the broadcast-over-c folded into conv2.
        "w1_mat": w1.transpose(2, 3, 1, 0).reshape(9 * 4 * Cg, 256)
                    .astype(jnp.bfloat16),
        "w2b_mat": jnp.repeat((0.25 * w2.reshape(up2 * 9, 256)).T, C_in, axis=1)
                      .astype(jnp.bfloat16),                       # (256, 9*group)
        "b2b": jnp.repeat(0.25 * b2, C_in),                        # (9*group,)
        "bx": jnp.kron(jnp.eye(9, dtype=jnp.float32),
                       jnp.tile(jnp.eye(C_in, dtype=jnp.float32), (1, up2)))
                 .astype(jnp.bfloat16),                            # (9*C, 9*group)
        "rr": jnp.tile(jnp.eye(group, dtype=jnp.float32), (9, 1))
                 .astype(jnp.bfloat16),                            # (9*group, group)
        "wc_mat": wc.transpose(2, 3, 1, 0).reshape(ksz * ksz * C_in, C_out)
                    .astype(jnp.bfloat16),
    }

    x = jax.random.normal(kx, (B, C_in, H, W), jnp.float32)
    guide = jax.random.normal(kg, (B, Cg, 2 * H, 2 * W), jnp.float32)

    fwd = jax.jit(lambda xx, gg: decoder_forward(
        xx, gg, params, up=up, ksz=ksz, stride=stride, padding=pad))
    out = jax.block_until_ready(fwd(x, guide))

    ref = jax.block_until_ready(
        decoder_reference(x, guide, params, up=up, ksz=ksz, stride=stride,
                          padding=pad))

    assert out.shape == (B, C_out, up * H, up * W), out.shape
    assert jnp.all(jnp.isfinite(out))
    # tolerance: bf16 MXU operands + f32 accumulation vs XLA f32 conv
    assert jnp.allclose(out, ref, atol=3e-2, rtol=3e-2), \
        float(jnp.max(jnp.abs(out - ref)))

    print("KERNEL_OK")
</pallas_src>

<mosaic_0001>
module attributes {stable_mosaic.version = 11 : i64} {
  func.func @_fused_upsample_kernel(%arg0: i32, %arg1: memref<64x144xbf16, #tpu.memory_space<vmem>>, %arg2: memref<64x36xbf16, #tpu.memory_space<vmem>>, %arg3: memref<144x256xbf16, #tpu.memory_space<vmem>>, %arg4: memref<1x256xf32, #tpu.memory_space<vmem>>, %arg5: memref<1x1xf32, #tpu.memory_space<smem>>, %arg6: memref<256x144xbf16, #tpu.memory_space<vmem>>, %arg7: memref<1x144xf32, #tpu.memory_space<vmem>>, %arg8: memref<36x144xbf16, #tpu.memory_space<vmem>>, %arg9: memref<144x16xbf16, #tpu.memory_space<vmem>>, %arg10: memref<64x16xf32, #tpu.memory_space<vmem>>) attributes {dimension_semantics = [#tpu.dimension_semantics<parallel>], iteration_bounds = array<i64: 2>, scalar_prefetch = 0 : i64, scratch_operands = 0 : i64, tpu.core_type = #tpu.core_type<tc>, window_params = [{transform_indices = @transform_0, window_bounds = array<i64: 64, 144>}, {transform_indices = @transform_1, window_bounds = array<i64: 64, 36>}, {pipeline_mode = #tpu.pipeline_mode<synchronous>, transform_indices = @transform_2, window_bounds = array<i64: 144, 256>}, {pipeline_mode = #tpu.pipeline_mode<synchronous>, transform_indices = @transform_3, window_bounds = array<i64: 1, 256>}, {transform_indices = @transform_4, window_bounds = array<i64: 1, 1>}, {pipeline_mode = #tpu.pipeline_mode<synchronous>, transform_indices = @transform_5, window_bounds = array<i64: 256, 144>}, {pipeline_mode = #tpu.pipeline_mode<synchronous>, transform_indices = @transform_6, window_bounds = array<i64: 1, 144>}, {pipeline_mode = #tpu.pipeline_mode<synchronous>, transform_indices = @transform_7, window_bounds = array<i64: 36, 144>}, {pipeline_mode = #tpu.pipeline_mode<synchronous>, transform_indices = @transform_8, window_bounds = array<i64: 144, 16>}, {transform_indices = @transform_9, window_bounds = array<i64: 64, 16>}]} {
    %c0 = arith.constant 0 : index
    %c0_0 = arith.constant 0 : index
    %0 = vector.load %arg1[%c0, %c0_0] : memref<64x144xbf16, #tpu.memory_space<vmem>>, vector<64x144xbf16>
    %c0_1 = arith.constant 0 : index
    %c0_2 = arith.constant 0 : index
    %1 = vector.load %arg3[%c0_1, %c0_2] : memref<144x256xbf16, #tpu.memory_space<vmem>>, vector<144x256xbf16>
    %cst = arith.constant dense<0.000000e+00> : vector<64x256xf32>
    %2 = tpu.matmul %0, %1, %cst {dimension_numbers = #tpu.dot_dimension_numbers<[1], [0], [0], [1], [0, 0, 1, 1], [], []>} : vector<64x144xbf16>, vector<144x256xbf16>, vector<64x256xf32> -> vector<64x256xf32>
    %c0_3 = arith.constant 0 : index
    %c0_4 = arith.constant 0 : index
    %3 = vector.load %arg4[%c0_3, %c0_4] : memref<1x256xf32, #tpu.memory_space<vmem>>, vector<1x256xf32>
    %4 = vector.broadcast %3 : vector<1x256xf32> to vector<64x256xf32>
    %5 = arith.addf %2, %4 : vector<64x256xf32>
    %c0_5 = arith.constant 0 : index
    %c0_6 = arith.constant 0 : index
    %6 = memref.load %arg5[%c0_5, %c0_6] : memref<1x1xf32, #tpu.memory_space<smem>>
    %cst_7 = arith.constant 0.000000e+00 : f32
    %7 = vector.broadcast %cst_7 : f32 to vector<64x256xf32>
    %8 = arith.cmpf oge, %5, %7 : vector<64x256xf32>
    %9 = vector.broadcast %6 : f32 to vector<64x256xf32>
    %10 = arith.mulf %9, %5 : vector<64x256xf32>
    %11 = arith.select %8, %5, %10 : vector<64x256xi1>, vector<64x256xf32>
    %12 = arith.truncf %11 : vector<64x256xf32> to vector<64x256xbf16>
    %c0_8 = arith.constant 0 : index
    %c0_9 = arith.constant 0 : index
    %13 = vector.load %arg6[%c0_8, %c0_9] : memref<256x144xbf16, #tpu.memory_space<vmem>>, vector<256x144xbf16>
    %cst_10 = arith.constant dense<0.000000e+00> : vector<64x144xf32>
    %14 = tpu.matmul %12, %13, %cst_10 {dimension_numbers = #tpu.dot_dimension_numbers<[1], [0], [0], [1], [0, 0, 1, 1], [], []>} : vector<64x256xbf16>, vector<256x144xbf16>, vector<64x144xf32> -> vector<64x144xf32>
    %c0_11 = arith.constant 0 : index
    %c0_12 = arith.constant 0 : index
    %15 = vector.load %arg7[%c0_11, %c0_12] : memref<1x144xf32, #tpu.memory_space<vmem>>, vector<1x144xf32>
    %16 = vector.broadcast %15 : vector<1x144xf32> to vector<64x144xf32>
    %17 = arith.addf %14, %16 : vector<64x144xf32>
    %18 = vector.extract_strided_slice %17 {offsets = [0, 0], sizes = [64, 16], strides = [1, 1]} : vector<64x144xf32> to vector<64x16xf32>
    %19 = vector.extract_strided_slice %17 {offsets = [0, 16], sizes = [64, 16], strides = [1, 1]} : vector<64x144xf32> to vector<64x16xf32>
    %20 = arith.maximumf %18, %19 : vector<64x16xf32>
    %21 = vector.extract_strided_slice %17 {offsets = [0, 32], sizes = [64, 16], strides = [1, 1]} : vector<64x144xf32> to vector<64x16xf32>
    %22 = arith.maximumf %20, %21 : vector<64x16xf32>
    %23 = vector.extract_strided_slice %17 {offsets = [0, 48], sizes = [64, 16], strides = [1, 1]} : vector<64x144xf32> to vector<64x16xf32>
    %24 = arith.maximumf %22, %23 : vector<64x16xf32>
    %25 = vector.extract_strided_slice %17 {offsets = [0, 64], sizes = [64, 16], strides = [1, 1]} : vector<64x144xf32> to vector<64x16xf32>
    %26 = arith.maximumf %24, %25 : vector<64x16xf32>
    %27 = vector.extract_strided_slice %17 {offsets = [0, 80], sizes = [64, 16], strides = [1, 1]} : vector<64x144xf32> to vector<64x16xf32>
    %28 = arith.maximumf %26, %27 : vector<64x16xf32>
    %29 = vector.extract_strided_slice %17 {offsets = [0, 96], sizes = [64, 16], strides = [1, 1]} : vector<64x144xf32> to vector<64x16xf32>
    %30 = arith.maximumf %28, %29 : vector<64x16xf32>
    %31 = vector.extract_strided_slice %17 {offsets = [0, 112], sizes = [64, 16], strides = [1, 1]} : vector<64x144xf32> to vector<64x16xf32>
    %32 = arith.maximumf %30, %31 : vector<64x16xf32>
    %33 = vector.extract_strided_slice %17 {offsets = [0, 128], sizes = [64, 16], strides = [1, 1]} : vector<64x144xf32> to vector<64x16xf32>
    %34 = arith.maximumf %32, %33 : vector<64x16xf32>
    %35 = tpu.concatenate %34, %34, %34, %34, %34, %34, %34, %34, %34 in 1 : vector<64x16xf32>, vector<64x16xf32>, vector<64x16xf32>, vector<64x16xf32>, vector<64x16xf32>, vector<64x16xf32>, vector<64x16xf32>, vector<64x16xf32>, vector<64x16xf32> -> vector<64x144xf32>
    %36 = arith.subf %17, %35 : vector<64x144xf32>
    %37 = math.exp %36 : vector<64x144xf32>
    %c0_13 = arith.constant 0 : index
    %c0_14 = arith.constant 0 : index
    %38 = vector.load %arg2[%c0_13, %c0_14] : memref<64x36xbf16, #tpu.memory_space<vmem>>, vector<64x36xbf16>
    %c0_15 = arith.constant 0 : index
    %c0_16 = arith.constant 0 : index
    %39 = vector.load %arg8[%c0_15, %c0_16] : memref<36x144xbf16, #tpu.memory_space<vmem>>, vector<36x144xbf16>
    %cst_17 = arith.constant dense<0.000000e+00> : vector<64x144xf32>
    %40 = tpu.matmul %38, %39, %cst_17 {dimension_numbers = #tpu.dot_dimension_numbers<[1], [0], [0], [1], [0, 0, 1, 1], [], []>} : vector<64x36xbf16>, vector<36x144xbf16>, vector<64x144xf32> -> vector<64x144xf32>
    %41 = arith.mulf %37, %40 : vector<64x144xf32>
    %42 = arith.truncf %41 : vector<64x144xf32> to vector<64x144xbf16>
    %c0_18 = arith.constant 0 : index
    %c0_19 = arith.constant 0 : index
    %43 = vector.load %arg9[%c0_18, %c0_19] : memref<144x16xbf16, #tpu.memory_space<vmem>>, vector<144x16xbf16>
    %cst_20 = arith.constant dense<0.000000e+00> : vector<64x16xf32>
    %44 = tpu.matmul %42, %43, %cst_20 {dimension_numbers = #tpu.dot_dimension_numbers<[1], [0], [0], [1], [0, 0, 1, 1], [], []>} : vector<64x144xbf16>, vector<144x16xbf16>, vector<64x16xf32> -> vector<64x16xf32>
    %45 = arith.truncf %37 : vector<64x144xf32> to vector<64x144xbf16>
    %c0_21 = arith.constant 0 : index
    %c0_22 = arith.constant 0 : index
    %46 = vector.load %arg9[%c0_21, %c0_22] : memref<144x16xbf16, #tpu.memory_space<vmem>>, vector<144x16xbf16>
    %cst_23 = arith.constant dense<0.000000e+00> : vector<64x16xf32>
    %47 = tpu.matmul %45, %46, %cst_23 {dimension_numbers = #tpu.dot_dimension_numbers<[1], [0], [0], [1], [0, 0, 1, 1], [], []>} : vector<64x144xbf16>, vector<144x16xbf16>, vector<64x16xf32> -> vector<64x16xf32>
    %48 = arith.divf %44, %47 : vector<64x16xf32>
    %c0_24 = arith.constant 0 : index
    %c0_25 = arith.constant 0 : index
    %49 = vector.load %arg10[%c0_24, %c0_25] : memref<64x16xf32, #tpu.memory_space<vmem>>, vector<64x16xf32>
    tpu.vector_store %arg10[%c0_24, %c0_25], %48 {strides = array<i32>} : memref<64x16xf32, #tpu.memory_space<vmem>>, vector<64x16xf32>,
    return
  }
  func.func @transform_0(%arg0: i32) -> (i32, i32) {
    %c0_i32 = arith.constant 0 : i32
    %c0_i32_0 = arith.constant 0 : i32
    return %arg0, %c0_i32 : i32, i32
  }
  func.func @transform_1(%arg0: i32) -> (i32, i32) {
    %c0_i32 = arith.constant 0 : i32
    %c0_i32_0 = arith.constant 0 : i32
    return %arg0, %c0_i32 : i32, i32
  }
  func.func @transform_2(%arg0: i32) -> (i32, i32) {
    %c0_i32 = arith.constant 0 : i32
    %c0_i32_0 = arith.constant 0 : i32
    %c0_i32_1 = arith.constant 0 : i32
    return %c0_i32, %c0_i32_0 : i32, i32
  }
  func.func @transform_3(%arg0: i32) -> (i32, i32) {
    %c0_i32 = arith.constant 0 : i32
    %c0_i32_0 = arith.constant 0 : i32
    %c0_i32_1 = arith.constant 0 : i32
    return %c0_i32, %c0_i32_0 : i32, i32
  }
  func.func @transform_4(%arg0: i32) -> (i32, i32) {
    %c0_i32 = arith.constant 0 : i32
    %c0_i32_0 = arith.constant 0 : i32
    %c0_i32_1 = arith.constant 0 : i32
    return %c0_i32, %c0_i32_0 : i32, i32
  }
  func.func @transform_5(%arg0: i32) -> (i32, i32) {
    %c0_i32 = arith.constant 0 : i32
    %c0_i32_0 = arith.constant 0 : i32
    %c0_i32_1 = arith.constant 0 : i32
    return %c0_i32, %c0_i32_0 : i32, i32
  }
  func.func @transform_6(%arg0: i32) -> (i32, i32) {
    %c0_i32 = arith.constant 0 : i32
    %c0_i32_0 = arith.constant 0 : i32
    %c0_i32_1 = arith.constant 0 : i32
    return %c0_i32, %c0_i32_0 : i32, i32
  }
  func.func @transform_7(%arg0: i32) -> (i32, i32) {
    %c0_i32 = arith.constant 0 : i32
    %c0_i32_0 = arith.constant 0 : i32
    %c0_i32_1 = arith.constant 0 : i32
    return %c0_i32, %c0_i32_0 : i32, i32
  }
  func.func @transform_8(%arg0: i32) -> (i32, i32) {
    %c0_i32 = arith.constant 0 : i32
    %c0_i32_0 = arith.constant 0 : i32
    %c0_i32_1 = arith.constant 0 : i32
    return %c0_i32, %c0_i32_0 : i32, i32
  }
  func.func @transform_9(%arg0: i32) -> (i32, i32) {
    %c0_i32 = arith.constant 0 : i32
    %c0_i32_0 = arith.constant 0 : i32
    return %arg0, %c0_i32 : i32, i32
  }
}

module attributes {stable_mosaic.version = 11 : i64} {
  func.func @_conv_prelu_kernel(%arg0: i32, %arg1: memref<256x36xbf16, #tpu.memory_space<vmem>>, %arg2: memref<36x8xbf16, #tpu.memory_space<vmem>>, %arg3: memref<1x8xf32, #tpu.memory_space<vmem>>, %arg4: memref<1x1xf32, #tpu.memory_space<smem>>, %arg5: memref<256x8xf32, #tpu.memory_space<vmem>>) attributes {dimension_semantics = [#tpu.dimension_semantics<parallel>], iteration_bounds = array<i64: 2>, scalar_prefetch = 0 : i64, scratch_operands = 0 : i64, tpu.core_type = #tpu.core_type<tc>, window_params = [{transform_indices = @transform_0, window_bounds = array<i64: 256, 36>}, {pipeline_mode = #tpu.pipeline_mode<synchronous>, transform_indices = @transform_1, window_bounds = array<i64: 36, 8>}, {pipeline_mode = #tpu.pipeline_mode<synchronous>, transform_indices = @transform_2, window_bounds = array<i64: 1, 8>}, {transform_indices = @transform_3, window_bounds = array<i64: 1, 1>}, {transform_indices = @transform_4, window_bounds = array<i64: 256, 8>}]} {
    %c0 = arith.constant 0 : index
    %c0_0 = arith.constant 0 : index
    %0 = vector.load %arg1[%c0, %c0_0] : memref<256x36xbf16, #tpu.memory_space<vmem>>, vector<256x36xbf16>
    %c0_1 = arith.constant 0 : index
    %c0_2 = arith.constant 0 : index
    %1 = vector.load %arg2[%c0_1, %c0_2] : memref<36x8xbf16, #tpu.memory_space<vmem>>, vector<36x8xbf16>
    %cst = arith.constant dense<0.000000e+00> : vector<256x8xf32>
    %2 = tpu.matmul %0, %1, %cst {dimension_numbers = #tpu.dot_dimension_numbers<[1], [0], [0], [1], [0, 0, 1, 1], [], []>} : vector<256x36xbf16>, vector<36x8xbf16>, vector<256x8xf32> -> vector<256x8xf32>
    %c0_3 = arith.constant 0 : index
    %c0_4 = arith.constant 0 : index
    %3 = vector.load %arg3[%c0_3, %c0_4] : memref<1x8xf32, #tpu.memory_space<vmem>>, vector<1x8xf32>
    %4 = vector.broadcast %3 : vector<1x8xf32> to vector<256x8xf32>
    %5 = arith.addf %2, %4 : vector<256x8xf32>
    %c0_5 = arith.constant 0 : index
    %c0_6 = arith.constant 0 : index
    %6 = memref.load %arg4[%c0_5, %c0_6] : memref<1x1xf32, #tpu.memory_space<smem>>
    %cst_7 = arith.constant 0.000000e+00 : f32
    %7 = vector.broadcast %cst_7 : f32 to vector<256x8xf32>
    %8 = arith.cmpf oge, %5, %7 : vector<256x8xf32>
    %9 = vector.broadcast %6 : f32 to vector<256x8xf32>
    %10 = arith.mulf %9, %5 : vector<256x8xf32>
    %11 = arith.select %8, %5, %10 : vector<256x8xi1>, vector<256x8xf32>
    %c0_8 = arith.constant 0 : index
    %c0_9 = arith.constant 0 : index
    %12 = vector.load %arg5[%c0_8, %c0_9] : memref<256x8xf32, #tpu.memory_space<vmem>>, vector<256x8xf32>
    tpu.vector_store %arg5[%c0_8, %c0_9], %11 {strides = array<i32>} : memref<256x8xf32, #tpu.memory_space<vmem>>, vector<256x8xf32>,
    return
  }
  func.func @transform_0(%arg0: i32) -> (i32, i32) {
    %c0_i32 = arith.constant 0 : i32
    %c0_i32_0 = arith.constant 0 : i32
    return %arg0, %c0_i32 : i32, i32
  }
  func.func @transform_1(%arg0: i32) -> (i32, i32) {
    %c0_i32 = arith.constant 0 : i32
    %c0_i32_0 = arith.constant 0 : i32
    %c0_i32_1 = arith.constant 0 : i32
    return %c0_i32, %c0_i32_0 : i32, i32
  }
  func.func @transform_2(%arg0: i32) -> (i32, i32) {
    %c0_i32 = arith.constant 0 : i32
    %c0_i32_0 = arith.constant 0 : i32
    %c0_i32_1 = arith.constant 0 : i32
    return %c0_i32, %c0_i32_0 : i32, i32
  }
  func.func @transform_3(%arg0: i32) -> (i32, i32) {
    %c0_i32 = arith.constant 0 : i32
    %c0_i32_0 = arith.constant 0 : i32
    %c0_i32_1 = arith.constant 0 : i32
    return %c0_i32, %c0_i32_0 : i32, i32
  }
  func.func @transform_4(%arg0: i32) -> (i32, i32) {
    %c0_i32 = arith.constant 0 : i32
    %c0_i32_0 = arith.constant 0 : i32
    return %arg0, %c0_i32 : i32, i32
  }
}

</mosaic_0001>

<bundles_post_ra>
// kernel: _lambda_.2
= control target key start
LH: loop header
LB: loop body
LE: loop exit
PB: predicated region body
PF: predicated region fallthrough
CT: control target
= control target key end

     0   :  { %s2325_s11 = smov 0   ;;  %s3179_s0 = inlined_call_operand.vmem [shape: bf16[128,144], index: 0, kind: input, shape index: {}]   ;;  %s3180_s1 = inlined_call_operand.vmem [shape: bf16[128,36], index: 1, kind: input, shape index: {}]   ;;  %s3181_s2 = inlined_call_operand.vmem [shape: bf16[144,256], index: 2, kind: input, shape index: {}]   ;;  %s3182_s3 = inlined_call_operand.vmem [shape: f32[1,256], index: 3, kind: input, shape index: {}]   ;;  %s3183_s4 = inlined_call_operand.<no memory space> [shape: f32[1,1], index: 4, kind: input, shape index: {}]   ;;  %s3184_s5 = inlined_call_operand.vmem [shape: bf16[256,144], index: 5, kind: input, shape index: {}]   ;;  %s3185_s6 = inlined_call_operand.vmem [shape: f32[1,144], index: 6, kind: input, shape index: {}]   ;;  %s3186_s7 = inlined_call_operand.vmem [shape: bf16[36,144], index: 7, kind: input, shape index: {}]   ;;  %s3187_s8 = inlined_call_operand.vmem [shape: bf16[144,16], index: 8, kind: input, shape index: {}]   ;;  %s3188_s9 = inlined_call_operand.vmem [shape: f32[128,16], index: 9, kind: output, shape index: {}]  }
   0x1   :  { %14 = sst [smem:[#allocation2]] %s3183_s4 }
   0x2 LB: > { %s1975_s12 = sadd.s32 4294967295, %s2262_s11   ;;  %p1979_p0 = scmp.ge.s32.totalorder %s2262_s11, 1  ;;  %s2262_s11 = sphi %s2325_s11, %s20_s11  }
   0x3   : > { %p301_p1 = scmp.lt.s32.totalorder %s2262_s11, 3 }
   0x5   : > { %p302_p2 = pnand %p1979_p0, %p301_p1 }
   0x6   : > { %v2100_v0 = vld [vmem:[%s3181_s2 + $0x4] ss:$8 sps:$4 sm:$0xff] (!%p302_p2)   ;;  %s1980_s4 = sshll.u32 (!%p302_p2), %s1975_s12, 3  ;;  %v2102_v1 = vld [vmem:[%s3181_s2] ss:$8 sps:$4 sm:$0xff] (!%p302_p2)   ;;  %vm527_vm0 = vcmask (!%p302_p2), 130048  }
   0x7   : > { %305 = sbr.rel (%p302_p2) target bundleno = 1104 (0x450), region = 56  ;;  %p344_p3 = scmp.lt.s32.totalorder (!%p302_p2), %s1980_s4, 15  ;;  %540 = vmatprep.subr.bf16.mxu0 (!%p302_p2), %v2100_v0  ;;  %v2103_v2 = vld [vmem:[%s3181_s2 + $0x14] ss:$8 sps:$4 sm:$0xff] (!%p302_p2)   ;;  %v2105_v3 = vld [vmem:[%s3181_s2 + $0x10] ss:$8 sps:$4 sm:$0xff] (!%p302_p2)  }
   0x8   : > { %541 = vmatpush1.bf16.msra.mxu0 (!%p302_p2), %v2102_v1  ;;  %v2106_v4 = vld [vmem:[%s3181_s2 + $0x24] ss:$8 sps:$4 sm:$0xff] (!%p302_p2)   ;;  %v2108_v5 = vld [vmem:[%s3181_s2 + $0x20] ss:$8 sps:$4 sm:$0xff] (!%p302_p2)   ;;  %v2109_v6 = vld [vmem:[%s3181_s2 + $0x34] ss:$8 sps:$4 sm:$0xff] (!%p302_p2)  }
   0x9   : > { %542 = vmatprep.subr.bf16.mxu0 (!%p302_p2), %v2103_v2  ;;  %v2111_v7 = vld [vmem:[%s3181_s2 + $0x30] ss:$8 sps:$4 sm:$0xff] (!%p302_p2)   ;;  %v2112_v8 = vld [vmem:[%s3181_s2 + $0x44] ss:$8 sps:$4 sm:$0xff] (!%p302_p2)   ;;  %v2114_v10 = vld [vmem:[%s3181_s2 + $0x40] ss:$8 sps:$4 sm:$0xff] (!%p302_p2)  }
   0xa   : > { %v2115_v11 = vld [vmem:[%s3181_s2 + $0x54] ss:$8 sps:$4 sm:$0xff] (!%p302_p2)   ;;  %v2139_v12 = vld [vmem:[%s3184_s5 + $0x4] ss:$8 sps:$4 sm:$0xff] (!%p302_p2)   ;;  %v2141_v13 = vld [vmem:[%s3184_s5] ss:$8 sps:$4 sm:$0xff] (!%p302_p2)  }
   0xb   : > { %v2117_v14 = vld [vmem:[%s3181_s2 + $0x50] ss:$8 sps:$4 sm:$0xff] (!%p302_p2)   ;;  %v2142_v15 = vld [vmem:[%s3184_s5 + $0x14] ss:$8 sps:$4 sm:$0xff] (!%p302_p2)   ;;  %v2118_v16 = vld [vmem:[%s3181_s2 + $0x64] ss:$8 sps:$4 sm:$0xff] (!%p302_p2)   ;;  %875 = vmatprep.subr.bf16.mxu1 (!%p302_p2), %v2139_v12 }
   0xc   : > { %543 = vmatpush1.bf16.msra.mxu0 (!%p302_p2), %v2105_v3  ;;  %876 = vmatpush1.bf16.msra.mxu1 (!%p302_p2), %v2141_v13  ;;  %v2144_v17 = vld [vmem:[%s3184_s5 + $0x10] ss:$8 sps:$4 sm:$0xff] (!%p302_p2)   ;;  %v2145_v18 = vld [vmem:[%s3184_s5 + $0x24] ss:$8 sps:$4 sm:$0xff] (!%p302_p2)   ;;  %v2120_v19 = vld [vmem:[%s3181_s2 + $0x60] ss:$8 sps:$4 sm:$0xff] (!%p302_p2)  }
   0xd   : > { %544 = vmatprep.subr.bf16.mxu0 (!%p302_p2), %v2106_v4  ;;  %877 = vmatprep.subr.bf16.mxu1 (!%p302_p2), %v2142_v15  ;;  %v2121_v20 = vld [vmem:[%s3181_s2 + $0x74] ss:$8 sps:$4 sm:$0xff] (!%p302_p2)   ;;  %v2147_v21 = vld [vmem:[%s3184_s5 + $0x20] ss:$8 sps:$4 sm:$0xff] (!%p302_p2)   ;;  %v2123_v23 = vld [vmem:[%s3181_s2 + $0x70] ss:$8 sps:$4 sm:$0xff] (!%p302_p2)  }
   0xe   : > { %s3190_s4 = smov (!%p344_p3, %s1980_s4), 15  ;;  %v2148_v22 = vld [vmem:[%s3184_s5 + $0x34] ss:$8 sps:$4 sm:$0xff]   ;;  %v2124_v24 = vld [vmem:[%s3181_s2 + $0x84] ss:$8 sps:$4 sm:$0xff]   ;;  %v2264_v62 = vmov 0  }
   0xf   : > { %s2083_s25 = sshll.u32 %s3190_s4, 3  ;;  %v2150_v25 = vld [vmem:[%s3184_s5 + $0x30] ss:$8 sps:$4 sm:$0xff]   ;;  %v2151_v26 = vld [vmem:[%s3184_s5 + $0x44] ss:$8 sps:$4 sm:$0xff]   ;;  %s1984_s15 = sshll.u32 %s3190_s4, 2 }
  0x10   : > { %s2362_s30 = scalar_lea.vmem %s3179_s0, %s2083_s25  ;;  %545 = vmatpush1.bf16.msra.mxu0 %v2108_v5  ;;  %878 = vmatpush1.bf16.msra.mxu1 %v2144_v17  ;;  %v2126_v27 = vld [vmem:[%s3181_s2 + $0x80] ss:$8 sps:$4 sm:$0xff]   ;;  %v2154_v31 = vld [vmem:[%s3184_s5 + $0x54] ss:$8 sps:$4 sm:$0xff]   ;;  %v2156_v32 = vld [vmem:[%s3184_s5 + $0x50] ss:$8 sps:$4 sm:$0xff]   ;;  %s2444_s27 = scalar_lea.vmem %s3180_s1, %s1984_s15  ;;  %v391_v5 = vlaneseq }
  0x11   : > { %546 = vmatprep.subr.bf16.mxu0 %v2109_v6  ;;  %v2129_v9 = vld [vmem:[%s2362_s30 + $0x4] ss:$8 sps:$4 sm:$0xff]   ;;  %879 = vmatprep.subr.bf16.mxu1 %v2145_v18  ;;  %v2153_v28 = vld [vmem:[%s3184_s5 + $0x40] ss:$8 sps:$4 sm:$0xff]   ;;  %v2130_v30 = vld [vmem:[%s2362_s30 + $0x14] ss:$8 sps:$4 sm:$0xff]  }
  0x12   : > { %2013 = vmatprep.mubr.msk.bf16.mxu0 %vm527_vm0, %v2129_v9  ;;  %v2127_v29 = vld [vmem:[%s2362_s30] ss:$8 sps:$4 sm:$0xff]   ;;  %v2157_v33 = vld [vmem:[%s3184_s5 + $0x64] ss:$8 sps:$4 sm:$0xff]   ;;  %v2132_v35 = vld [vmem:[%s2362_s30 + $0x10] ss:$8 sps:$4 sm:$0xff]  }
  0x13   : > { %v2159_v34 = vld [vmem:[%s3184_s5 + $0x60] ss:$8 sps:$4 sm:$0xff]   ;;  %v2160_v36 = vld [vmem:[%s3184_s5 + $0x74] ss:$8 sps:$4 sm:$0xff]   ;;  %v2133_v37 = vld [vmem:[%s2362_s30 + $0x24] ss:$8 sps:$4 sm:$0xff]  }
  0x14   : > { %547 = vmatpush1.bf16.msra.mxu0 %v2111_v7  ;;  %880 = vmatpush1.bf16.msra.mxu1 %v2147_v21  ;;  %v2162_v38 = vld [vmem:[%s3184_s5 + $0x70] ss:$8 sps:$4 sm:$0xff]   ;;  %v2163_v39 = vld [vmem:[%s3184_s5 + $0x84] ss:$8 sps:$4 sm:$0xff]   ;;  %v2165_v40 = vld [vmem:[%s3184_s5 + $0x80] ss:$8 sps:$4 sm:$0xff]  }
  0x15   : > { %548 = vmatprep.subr.bf16.mxu0 %v2112_v8  ;;  %881 = vmatprep.subr.bf16.mxu1 %v2148_v22  ;;  %v2135_v41 = vld [vmem:[%s2362_s30 + $0x20] ss:$8 sps:$4 sm:$0xff]   ;;  %v2166_v42 = vld [vmem:[%s3184_s5 + $0x94] ss:$8 sps:$4 sm:$0xff]   ;;  %v2168_v44 = vld [vmem:[%s3184_s5 + $0x90] ss:$8 sps:$4 sm:$0xff]  }
  0x16   : > { %v2136_v43 = vld [vmem:[%s2362_s30 + $0x34] ss:$8 sps:$4 sm:$0xff]   ;;  %v2169_v45 = vld [vmem:[%s3184_s5 + $0xa4] ss:$8 sps:$4 sm:$0xff]   ;;  %v2171_v46 = vld [vmem:[%s3184_s5 + $0xa0] ss:$8 sps:$4 sm:$0xff]  }
  0x17   : > { %v2138_v47 = vld [vmem:[%s2362_s30 + $0x30] ss:$8 sps:$4 sm:$0xff]   ;;  %v2172_v48 = vld [vmem:[%s3184_s5 + $0xb4] ss:$8 sps:$4 sm:$0xff]   ;;  %v2175_v50 = vld [vmem:[%s3184_s5 + $0xc4] ss:$8 sps:$4 sm:$0xff]  }
  0x18   : > { %549 = vmatpush1.bf16.msra.mxu0 %v2114_v10  ;;  %882 = vmatpush1.bf16.msra.mxu1 %v2150_v25  ;;  %v2174_v49 = vld [vmem:[%s3184_s5 + $0xb0] ss:$8 sps:$4 sm:$0xff]   ;;  %v2177_v51 = vld [vmem:[%s3184_s5 + $0xc0] ss:$8 sps:$4 sm:$0xff]   ;;  %v2178_v52 = vld [vmem:[%s3184_s5 + $0xd4] ss:$8 sps:$4 sm:$0xff]  }
  0x19   : > { %550 = vmatprep.subr.bf16.mxu0 %v2115_v11  ;;  %883 = vmatprep.subr.bf16.mxu1 %v2151_v26  ;;  %v2180_v53 = vld [vmem:[%s3184_s5 + $0xd0] ss:$8 sps:$4 sm:$0xff]   ;;  %v2181_v54 = vld [vmem:[%s3184_s5 + $0xe4] ss:$8 sps:$4 sm:$0xff]   ;;  %v2183_v55 = vld [vmem:[%s3184_s5 + $0xe0] ss:$8 sps:$4 sm:$0xff]  }
  0x1a   : > { %v2184_v56 = vld [vmem:[%s3184_s5 + $0xf4] ss:$8 sps:$4 sm:$0xff]   ;;  %v2186_v57 = vld [vmem:[%s3184_s5 + $0xf0] ss:$8 sps:$4 sm:$0xff]   ;;  %v2187_v58 = vld [vmem:[%s3186_s7] ss:$8 sps:$4 sm:$0xff]  }
  0x1b   : > { %v2189_v59 = vld [vmem:[%s3186_s7 + $0x4] ss:$8 sps:$4 sm:$0xff]   ;;  %v2192_v60 = vld [vmem:[%s3186_s7 + $0x14] ss:$8 sps:$4 sm:$0xff]   ;;  %v2190_v63 = vld [vmem:[%s3186_s7 + $0x10] ss:$8 sps:$4 sm:$0xff]  }
  0x1c   : > { %551 = vmatpush1.bf16.msra.mxu0 %v2117_v14  ;;  %884 = vmatpush1.bf16.msra.mxu1 %v2153_v28  ;;  %v1486_v61 = vld [vmem:[%s3186_s7 + $0x20] sm:$0x33]  ;;  %vm1545_vm1 = vcmask 1041408   ;;  %vm1532_vm2 = vcmask 293888   ;;  %v2196_v4 = vld [vmem:[%s2444_s27 + $0x8] sm:$0xff]   ;;  %v2535_v6 = vshrl.u32 %v391_v5, 7 }
  0x1d   : > { %552 = vmatprep.subr.bf16.mxu0 %v2118_v16  ;;  %885 = vmatprep.subr.bf16.mxu1 %v2154_v31  ;;  %v2058_v0 = vcombine.high %v1486_v61, %v1486_v61  ;;  %v2057_v1 = vcombine.low %v1486_v61, %v1486_v61  ;;  %v2195_v3 = vld [vmem:[%s2444_s27] sm:$0xff]   ;;  %s613_s21 = sld [smem:[#allocation2]]  ;;  %s2266_s28 = smov 112  }
  0x1e   : > { %v393_v7 = vsub.s32 0, %v2535_v6  ;;  %v389_v8 = vld [vmem:[%s3182_s3] sm:$0x3]  ;;  %v397_v9 = vsub.s32 1, %v2535_v6  ;;  %s2267_s29 = smov 80   ;;  %s2268_s10 = smov 64  }
  0x1f   : > { %v1547_v2 = vsel %vm1545_vm1, %v2057_v1, 0  ;;  %s2269_s12 = smov 48   ;;  %s2270_s13 = smov 32  }
  0x20   : > { %553 = vmatpush1.bf16.msra.mxu0 %v2120_v19  ;;  %886 = vmatpush1.bf16.msra.mxu1 %v2156_v32  ;;  %v2544_v10 = vrot.slane %v389_v8, %v393_v7  ;;  %v2548_v11 = vrot.slane %v389_v8, %v397_v9  ;;  %s2271_s14 = smov 16  }
  0x21   : > { %554 = vmatprep.subr.bf16.mxu0 %v2121_v20  ;;  %887 = vmatprep.subr.bf16.mxu1 %v2157_v33 }
  0x23   : > { %v2550_v13 = vstv %s613_s21 }
  0x24   : > { %555 = vmatpush1.bf16.msra.mxu0 %v2123_v23  ;;  %888 = vmatpush1.bf16.msra.mxu1 %v2159_v34 }
  0x25   : > { %556 = vmatprep.subr.bf16.mxu0 %v2124_v24  ;;  %889 = vmatprep.subr.bf16.mxu1 %v2160_v36 }
  0x28   : > { %557 = vmatpush1.bf16.msra.mxu0 %v2126_v27  ;;  %890 = vmatpush1.bf16.msra.mxu1 %v2162_v38 }
  0x29   : > { %891 = vmatprep.subr.bf16.mxu1 %v2163_v39  ;;  %1552 = vmatprep.subr.bf16.mxu0 %v2189_v59 }
  0x2b   : > { %573 = vmatmul.mubr.bf16.vlgmr.msra.gmra.mrb[0].mxu0 %v2127_v29 }
  0x2c   : > { %2014 = vmatprep.mubr.msk.bf16.mxu0 %vm527_vm0, %v2130_v30  ;;  %892 = vmatpush1.bf16.msra.mxu1 %v2165_v40 }
  0x2d   : > { %893 = vmatprep.subr.bf16.mxu1 %v2166_v42  ;;  %1553 = vmatpush1.bf16.msra.mxu0 %v2187_v58 }
  0x2e   : > { %1554 = vmatprep.subr.bf16.mxu0 %v2192_v60 }
  0x30   : > { %894 = vmatpush1.bf16.msra.mxu1 %v2168_v44 }
  0x31   : > { %895 = vmatprep.subr.bf16.mxu1 %v2169_v45  ;;  %1555 = vmatpush1.bf16.msra.mxu0 %v2190_v63 }
  0x32   : > { %2059 = vmatprep.subr.msk.bf16.mxu0 %vm1545_vm1, %v2058_v0 }
  0x33   : > { %583 = vmatmul.mubr.bf16.gmra.mrb[4].mxu0 %v2132_v35 }
  0x34   : > { %2015 = vmatprep.mubr.msk.bf16.mxu0 %vm527_vm0, %v2133_v37  ;;  %896 = vmatpush1.bf16.msra.mxu1 %v2171_v46 }
  0x35   : > { %897 = vmatprep.subr.bf16.mxu1 %v2172_v48  ;;  %1557 = vmatpush1.bf16.msra.mxu0 %v1547_v2 }
  0x36   : > { %1818 = vmatprep.subr.bf16.mxu0 %v2264_v62 }
  0x38   : > { %898 = vmatpush1.bf16.msra.mxu1 %v2174_v49 }
  0x39   : > { %899 = vmatprep.subr.bf16.mxu1 %v2175_v50 }
  0x3b   : > { %593 = vmatmul.mubr.bf16.gmra.mrb[8].mxu0 %v2135_v41 }
  0x3c   : > { %2016 = vmatprep.mubr.msk.bf16.mxu0 %vm527_vm0, %v2136_v43  ;;  %900 = vmatpush1.bf16.msra.mxu1 %v2177_v51 }
  0x3d   : > { %901 = vmatprep.subr.bf16.mxu1 %v2178_v52 }
  0x40   : > { %902 = vmatpush1.bf16.msra.mxu1 %v2180_v53 }
  0x41   : > { %903 = vmatprep.subr.bf16.mxu1 %v2181_v54 }
  0x43   : > { %603 = vmatmul.mubr.bf16.gmra.mrb[12].mxu0 %v2138_v47 }
  0x44   : > { %904 = vmatpush1.bf16.msra.mxu1 %v2183_v55  ;;  %1584 = vmatprep.mubr.bf16.mxu0 %v2264_v62 }
  0x45   : > { %905 = vmatprep.subr.bf16.mxu1 %v2184_v56 }
  0x48   : > { %906 = vmatpush1.bf16.msra.mxu1 %v2186_v57 }
  0x49   : > { %1733 = vmatprep.subr.bf16.mxu1 %v2264_v62 }
  0x4b   : > { %2060 = vmatmul.mubr.msk.bf16.vlgmr.msra.gmra.mrb[16].mxu0 %vm1532_vm2, %v2195_v3 }
  0x4c   : > { %1594 = vmatprep.mubr.bf16.mxu0 %v2264_v62 }
  0x53   : > { %2061 = vmatmul.mubr.msk.bf16.gmra.mrb[20].mxu0 %vm1532_vm2, %v2196_v4 }
  0x54   : > { %1604 = vmatprep.mubr.bf16.mxu0 %v2264_v62 }
  0xfe   : > { %v574_v12 = vpop.f32.mrb[0].mxu0 }
  0xff   : > { %v575_v14 = vadd.f32 %v574_v12, %v2544_v10  ;;  %v576_v15 = vpop.f32.mrb[1].mxu0 }
 0x100   : > { %v577_v16 = vadd.f32 %v576_v15, %v2548_v11  ;;  %v578_v17 = vpop.f32.mrb[2].mxu0 }
 0x101   : > { %v631_v18 = vmul.f32 %v2550_v13, %v575_v14  ;;  %v579_v19 = vadd.f32 %v578_v17, %v2544_v10  ;;  %v580_v20 = vpop.f32.mrb[3].mxu0  ;;  %vm614_vm3 = vcmp.ge.f32.partialorder %v575_v14, 0.0 }
 0x102   : > { %v632_v21 = vmul.f32 %v2550_v13, %v577_v16  ;;  %v581_v22 = vadd.f32 %v580_v20, %v2548_v11  ;;  %vm615_vm5 = vcmp.ge.f32.partialorder %v577_v16, 0.0 }
 0x103   : > { %vm616_vm4 = vcmp.ge.f32.partialorder %v579_v19, 0.0  ;;  %v633_v23 = vmul.f32 %v2550_v13, %v579_v19  ;;  %v647_v25 = vsel %vm614_vm3, %v575_v14, %v631_v18 }
 0x104   : > { %v634_v24 = vmul.f32 %v2550_v13, %v581_v22  ;;  %vm617_vm6 = vcmp.ge.f32.partialorder %v581_v22, 0.0  ;;  %v648_v27 = vsel %vm615_vm5, %v577_v16, %v632_v21  ;;  %vm1381_vm5 = vcmask 392192  }
 0x105   : > { %v649_v26 = vsel %vm616_vm4, %v579_v19, %v633_v23 }
 0x106   : > { %v650_v28 = vsel %vm617_vm6, %v581_v22, %v634_v24  ;;  %v663_v29 = vpack.c.bf16 %v649_v26, %v647_v25  ;;  %v584_v30 = vpop.f32.mrb[4].mxu0  ;;  %vm1390_vm6 = vcmask 523264  }
 0x107   : > { %v664_v31 = vpack.c.bf16 %v650_v28, %v648_v27  ;;  %v585_v32 = vadd.f32 %v584_v30, %v2544_v10  ;;  %v586_v33 = vpop.f32.mrb[5].mxu0  ;;  %v2197_v27 = vld [vmem:[%s2444_s27 + $0x10] sm:$0xff]   ;;  %v703_v28 = vld [vmem:[%s3185_s6] sm:$0x3] }
 0x108   : > { %v587_v34 = vadd.f32 %v586_v33, %v2548_v11  ;;  %v588_v35 = vpop.f32.mrb[6].mxu0  ;;  %2062 = vmatmul.mubr.msk.bf16.gmra.mrb[24].mxu0 %vm1532_vm2, %v2197_v27 }
 0x109   : > { %907 = vmatprep.mubr.bf16.mxu1 %v664_v31  ;;  %vm618_vm7 = vcmp.ge.f32.partialorder %v585_v32, 0.0  ;;  %v635_v36 = vmul.f32 %v2550_v13, %v585_v32  ;;  %v589_v37 = vadd.f32 %v588_v35, %v2544_v10  ;;  %v590_v38 = vpop.f32.mrb[7].mxu0  ;;  %1614 = vmatprep.mubr.bf16.mxu0 %v2264_v62 }
 0x10a   : > { %908 = vmatmul.mubr.bf16.vlgmr.msra.gmra.mrb[0].mxu1 %v663_v29  ;;  %vm619_vm8 = vcmp.ge.f32.partialorder %v587_v34, 0.0  ;;  %v636_v39 = vmul.f32 %v2550_v13, %v587_v34  ;;  %v591_v40 = vadd.f32 %v590_v38, %v2548_v11 }
 0x10b   : > { %vm620_vm9 = vcmp.ge.f32.partialorder %v589_v37, 0.0  ;;  %v637_v41 = vmul.f32 %v2550_v13, %v589_v37  ;;  %v651_v42 = vsel %vm618_vm7, %v585_v32, %v635_v36  ;;  %vm1399_vm7 = vcmask 654336  }
 0x10c   : > { %vm621_vm10 = vcmp.ge.f32.partialorder %v591_v40, 0.0  ;;  %v638_v43 = vmul.f32 %v2550_v13, %v591_v40  ;;  %v652_v44 = vsel %vm619_vm8, %v587_v34, %v636_v39  ;;  %vm1408_vm8 = vcmask 785408  }
 0x10d   : > { %v653_v45 = vsel %vm620_vm9, %v589_v37, %v637_v41  ;;  %vm1417_vm9 = vcmask 916480  }
 0x10e   : > { %v654_v46 = vsel %vm621_vm10, %v591_v40, %v638_v43  ;;  %v665_v47 = vpack.c.bf16 %v653_v45, %v651_v42  ;;  %v594_v48 = vpop.f32.mrb[8].mxu0  ;;  %v2630_v40 = vrot.slane %v703_v28, %v397_v9 }
 0x10f   : > { %v666_v49 = vpack.c.bf16 %v654_v46, %v652_v44  ;;  %v595_v50 = vadd.f32 %v594_v48, %v2544_v10  ;;  %v596_v51 = vpop.f32.mrb[9].mxu0 }
 0x110   : > { %v597_v52 = vadd.f32 %v596_v51, %v2548_v11  ;;  %v598_v53 = vpop.f32.mrb[10].mxu0 }
 0x111   : > { %917 = vmatprep.mubr.bf16.mxu1 %v666_v49  ;;  %vm622_vm11 = vcmp.ge.f32.partialorder %v595_v50, 0.0  ;;  %v639_v54 = vmul.f32 %v2550_v13, %v595_v50  ;;  %v599_v55 = vadd.f32 %v598_v53, %v2544_v10  ;;  %v600_v56 = vpop.f32.mrb[11].mxu0 }
 0x112   : > { %918 = vmatmul.mubr.bf16.gmra.mrb[4].mxu1 %v665_v47  ;;  %vm623_vm12 = vcmp.ge.f32.partialorder %v597_v52, 0.0  ;;  %v640_v57 = vmul.f32 %v2550_v13, %v597_v52  ;;  %v601_v58 = vadd.f32 %v600_v56, %v2548_v11 }
 0x113   : > { %vm624_vm13 = vcmp.ge.f32.partialorder %v599_v55, 0.0  ;;  %v641_v59 = vmul.f32 %v2550_v13, %v599_v55  ;;  %v655_v60 = vsel %vm622_vm11, %v595_v50, %v639_v54 }
 0x114   : > { %vm625_vm14 = vcmp.ge.f32.partialorder %v601_v58, 0.0  ;;  %v642_v61 = vmul.f32 %v2550_v13, %v601_v58  ;;  %v656_v63 = vsel %vm623_vm12, %v597_v52, %v640_v57 }
 0x115   : > { %v657_v0 = vsel %vm624_vm13, %v599_v55, %v641_v59 }
 0x116   : > { %v658_v1 = vsel %vm625_vm14, %v601_v58, %v642_v61  ;;  %v667_v2 = vpack.c.bf16 %v657_v0, %v655_v60  ;;  %v604_v3 = vpop.f32.mrb[12].mxu0 }
 0x117   : > { %v668_v4 = vpack.c.bf16 %v658_v1, %v656_v63  ;;  %v605_v5 = vadd.f32 %v604_v3, %v2544_v10  ;;  %v606_v8 = vpop.f32.mrb[13].mxu0 }
 0x118   : > { %v607_v12 = vadd.f32 %v606_v8, %v2548_v11  ;;  %v608_v14 = vpop.f32.mrb[14].mxu0 }
 0x119   : > { %927 = vmatprep.mubr.bf16.mxu1 %v668_v4  ;;  %vm626_vm15 = vcmp.ge.f32.partialorder %v605_v5, 0.0  ;;  %v643_v15 = vmul.f32 %v2550_v13, %v605_v5  ;;  %v609_v16 = vadd.f32 %v608_v14, %v2544_v10  ;;  %v610_v17 = vpop.f32.mrb[15].mxu0 }
 0x11a   : > { %928 = vmatmul.mubr.bf16.gmra.mrb[8].mxu1 %v667_v2  ;;  %vm627_vm1 = vcmp.ge.f32.partialorder %v607_v12, 0.0  ;;  %v644_v18 = vmul.f32 %v2550_v13, %v607_v12  ;;  %v611_v19 = vadd.f32 %v610_v17, %v2548_v11  ;;  %v2198_v11 = vld [vmem:[%s2444_s27 + $0x18] sm:$0xff]   ;;  %s2265_s27 = smov 96  }
 0x11b   : > { %vm628_vm3 = vcmp.ge.f32.partialorder %v609_v16, 0.0  ;;  %v645_v20 = vmul.f32 %v2550_v13, %v609_v16  ;;  %v659_v21 = vsel %vm626_vm15, %v605_v5, %v643_v15  ;;  %2063 = vmatmul.mubr.msk.bf16.gmra.mrb[28].mxu0 %vm1532_vm2, %v2198_v11  ;;  %vm1372_vm2 = vcmask 261120  }
 0x11c   : > { %vm629_vm4 = vcmp.ge.f32.partialorder %v611_v19, 0.0  ;;  %v646_v22 = vmul.f32 %v2550_v13, %v611_v19  ;;  %v660_v23 = vsel %vm627_vm1, %v607_v12, %v644_v18  ;;  %v2594_v13 = vrot.slane %v703_v28, %v393_v7 }
 0x11d   : > { %v661_v24 = vsel %vm628_vm3, %v609_v16, %v645_v20 }
 0x11e   : > { %v662_v25 = vsel %vm629_vm4, %v611_v19, %v646_v22  ;;  %v669_v10 = vpack.c.bf16 %v661_v24, %v659_v21  ;;  %v2662_v51 = vpop.f32.mrb[16].mxu0 }
 0x11f   : > { %v670_v26 = vpack.c.bf16 %v662_v25, %v660_v23  ;;  %v2667_v53 = vpop.f32.mrb[17].mxu0 }
 0x120   : > { %v2685_v54 = vpop.f32.mrb[18].mxu0 }
 0x121   : > { %937 = vmatprep.mubr.bf16.mxu1 %v670_v26  ;;  %v2687_v55 = vpop.f32.mrb[19].mxu0 }
 0x122   : > { %938 = vmatmul.mubr.bf16.gmra.mrb[12].mxu1 %v669_v10 }
 0x126   : > { %v2697_v56 = vpop.f32.mrb[20].mxu0 }
 0x127   : > { %v2709_v59 = vpop.f32.mrb[21].mxu0 }
 0x128   : > { %v2715_v60 = vpop.f32.mrb[22].mxu0 }
 0x129   : > { %v2717_v61 = vpop.f32.mrb[23].mxu0 }
 0x1db   : > { %v2743_v63 = vpop.f32.mrb[24].mxu0 }
 0x1dc   : > { %v2745_v0 = vpop.f32.mrb[25].mxu0 }
 0x1dd   : > { %v909_v29 = vpop.f32.mrb[0].mxu1  ;;  %v2751_v1 = vpop.f32.mrb[26].mxu0 }
 0x1de   : > { %v2597_v30 = vadd.f32 %v909_v29, %v2594_v13  ;;  %v2599_v31 = vpop.f32.mrb[1].mxu1  ;;  %v2753_v2 = vpop.f32.mrb[27].mxu0 }
 0x1df   : > { %v913_v32 = vpop.f32.mrb[2].mxu1 }
 0x1e0   : > { %v2601_v33 = vpop.f32.mrb[3].mxu1  ;;  %988 = vrot.lane.b32.xlu1 %v2597_v30, %s2265_s27  ;;  %956 = vrot.lane.b32.xlu0 %v2597_v30, %s2266_s28  ;;  %v2608_v7 = vadd.f32 %v913_v32, %v2594_v13 }
 0x1e4   : > { %990 = vrot.lane.b32.xlu1 %v2608_v7, %s2265_s27  ;;  %1020 = vrot.lane.b32.xlu0 %v2597_v30, %s2267_s29 }
 0x1e5   : > { %v919_v34 = vpop.f32.mrb[4].mxu1 }
 0x1e6   : > { %v2614_v35 = vpop.f32.mrb[5].mxu1  ;;  %v2650_v47 = vadd.f32 %v919_v34, %v2594_v13 }
 0x1e7   : > { %v923_v36 = vpop.f32.mrb[6].mxu1 }
 0x1e8   : > { %1022 = vrot.lane.b32.xlu1 %v2608_v7, %s2267_s29  ;;  %1052 = vrot.lane.b32.xlu0 %v2597_v30, %s2268_s10  ;;  %v2620_v37 = vpop.f32.mrb[7].mxu1  ;;  %v2657_v48 = vadd.f32 %v923_v36, %v2594_v13 }
 0x1ec   : > { %1054 = vrot.lane.b32.xlu1 %v2608_v7, %s2268_s10  ;;  %1084 = vrot.lane.b32.xlu0 %v2597_v30, %s2269_s12 }
 0x1ed   : > { %v929_v38 = vpop.f32.mrb[8].mxu1 }
 0x1ee   : > { %v2626_v39 = vpop.f32.mrb[9].mxu1  ;;  %v2700_v57 = vadd.f32 %v929_v38, %v2594_v13  ;;  %v2779_v3 = vpop.f32.mrb[28].mxu0 }
 0x1ef   : > { %v933_v41 = vpop.f32.mrb[10].mxu1  ;;  %v2781_v4 = vpop.f32.mrb[29].mxu0 }
 0x1f0   : > { %1086 = vrot.lane.b32.xlu1 %v2608_v7, %s2269_s12  ;;  %1116 = vrot.lane.b32.xlu0 %v2597_v30, %s2270_s13  ;;  %v935_v42 = vpop.f32.mrb[11].mxu1  ;;  %v2707_v58 = vadd.f32 %v933_v41, %v2594_v13  ;;  %v2783_v5 = vpop.f32.mrb[30].mxu0 }
 0x1f1   : > { %v2637_v43 = vadd.f32 %v935_v42, %v2630_v40  ;;  %v2785_v14 = vpop.f32.mrb[31].mxu0 }
 0x1f4   : > { %1118 = vrot.lane.b32.xlu1 %v2608_v7, %s2270_s13  ;;  %1148 = vrot.lane.b32.xlu0 %v2597_v30, %s2271_s14 }
 0x1f5   : > { %v939_v6 = vpop.f32.mrb[12].mxu1 }
 0x1f6   : > { %v2644_v9 = vadd.f32 %v939_v6, %v2594_v13  ;;  %v941_v44 = vpop.f32.mrb[13].mxu1 }
 0x1f7   : > { %v2647_v45 = vadd.f32 %v941_v44, %v2630_v40  ;;  %v943_v46 = vpop.f32.mrb[14].mxu1 }
 0x1f8   : > { %1150 = vrot.lane.b32.xlu1 %v2608_v7, %s2271_s14  ;;  %958 = vrot.lane.b32.xlu0 %v2608_v7, %s2266_s28  ;;  %v2660_v49 = vadd.f32 %v943_v46, %v2594_v13  ;;  %v945_v50 = vpop.f32.mrb[15].mxu1  ;;  %v912_v13 = vadd.f32 %v2599_v31, %v2630_v40 }
 0x1f9   : > { %v2665_v52 = vadd.f32 %v945_v50, %v2630_v40 }
 0x1fc   : > { %962 = vrot.lane.b32.xlu1 %v2657_v48, %s2266_s28  ;;  %960 = vrot.lane.b32.xlu0 %v2650_v47, %s2266_s28 }
 0x200   : > { %994 = vrot.lane.b32.xlu1 %v2657_v48, %s2265_s27  ;;  %992 = vrot.lane.b32.xlu0 %v2650_v47, %s2265_s27 }
 0x204   : > { %1026 = vrot.lane.b32.xlu1 %v2657_v48, %s2267_s29  ;;  %1024 = vrot.lane.b32.xlu0 %v2650_v47, %s2267_s29 }
 0x208   : > { %1058 = vrot.lane.b32.xlu1 %v2657_v48, %s2268_s10  ;;  %1056 = vrot.lane.b32.xlu0 %v2650_v47, %s2268_s10 }
 0x20c   : > { %1090 = vrot.lane.b32.xlu1 %v2657_v48, %s2269_s12  ;;  %1088 = vrot.lane.b32.xlu0 %v2650_v47, %s2269_s12 }
 0x210   : > { %1122 = vrot.lane.b32.xlu1 %v2657_v48, %s2270_s13  ;;  %1120 = vrot.lane.b32.xlu0 %v2650_v47, %s2270_s13 }
 0x214   : > { %1154 = vrot.lane.b32.xlu1 %v2657_v48, %s2271_s14  ;;  %1152 = vrot.lane.b32.xlu0 %v2650_v47, %s2271_s14 }
 0x218   : > { %966 = vrot.lane.b32.xlu1 %v2707_v58, %s2266_s28  ;;  %964 = vrot.lane.b32.xlu0 %v2700_v57, %s2266_s28 }
 0x21c   : > { %998 = vrot.lane.b32.xlu1 %v2707_v58, %s2265_s27  ;;  %996 = vrot.lane.b32.xlu0 %v2700_v57, %s2265_s27 }
 0x220   : > { %1030 = vrot.lane.b32.xlu1 %v2707_v58, %s2267_s29  ;;  %1028 = vrot.lane.b32.xlu0 %v2700_v57, %s2267_s29 }
 0x224   : > { %1062 = vrot.lane.b32.xlu1 %v2707_v58, %s2268_s10  ;;  %1060 = vrot.lane.b32.xlu0 %v2700_v57, %s2268_s10 }
 0x228   : > { %1094 = vrot.lane.b32.xlu1 %v2707_v58, %s2269_s12  ;;  %1092 = vrot.lane.b32.xlu0 %v2700_v57, %s2269_s12 }
 0x22c   : > { %1126 = vrot.lane.b32.xlu1 %v2707_v58, %s2270_s13  ;;  %1124 = vrot.lane.b32.xlu0 %v2700_v57, %s2270_s13 }
 0x230   : > { %1158 = vrot.lane.b32.xlu1 %v2707_v58, %s2271_s14  ;;  %1156 = vrot.lane.b32.xlu0 %v2700_v57, %s2271_s14 }
 0x234   : > { %970 = vrot.lane.b32.xlu1 %v2660_v49, %s2266_s28  ;;  %968 = vrot.lane.b32.xlu0 %v2644_v9, %s2266_s28 }
 0x238   : > { %1002 = vrot.lane.b32.xlu1 %v2660_v49, %s2265_s27  ;;  %1000 = vrot.lane.b32.xlu0 %v2644_v9, %s2265_s27 }
 0x23c   : > { %1034 = vrot.lane.b32.xlu1 %v2660_v49, %s2267_s29  ;;  %1032 = vrot.lane.b32.xlu0 %v2644_v9, %s2267_s29 }
 0x240   : > { %1066 = vrot.lane.b32.xlu1 %v2660_v49, %s2268_s10  ;;  %1064 = vrot.lane.b32.xlu0 %v2644_v9, %s2268_s10 }
 0x244   : > { %1098 = vrot.lane.b32.xlu1 %v2660_v49, %s2269_s12  ;;  %1096 = vrot.lane.b32.xlu0 %v2644_v9, %s2269_s12 }
 0x248   : > { %1130 = vrot.lane.b32.xlu1 %v2660_v49, %s2270_s13  ;;  %1128 = vrot.lane.b32.xlu0 %v2644_v9, %s2270_s13 }
 0x24c   : > { %1162 = vrot.lane.b32.xlu1 %v2660_v49, %s2271_s14  ;;  %1160 = vrot.lane.b32.xlu0 %v2644_v9, %s2271_s14 }
 0x252   : > { %v989_v8 = vpop.permute.xlu1 %988  ;;  %v957_v12 = vpop.permute.xlu0 %956 }
 0x253   : > { %v980_v17 = vmax.f32 %v2597_v30, %v957_v12 }
 0x255   : > { %v1012_v20 = vmax.f32 %v980_v17, %v989_v8 }
 0x256   : > { %v991_v15 = vpop.permute.xlu1 %990  ;;  %v1021_v16 = vpop.permute.xlu0 %1020 }
 0x257   : > { %v1044_v23 = vmax.f32 %v1012_v20, %v1021_v16  ;;  %v2199_v16 = vld [vmem:[%s3187_s8] sm:$0xff]   ;;  %v916_v20 = vadd.f32 %v2601_v33, %v2630_v40 }
 0x258   : > { %1819 = vmatpush1.bf16.msra.mxu0 %v2199_v16  ;;  %1734 = vmatpush1.bf16.msra.mxu1 %v2199_v16 }
 0x259   : > { %1820 = vmatprep.subr.bf16.mxu0 %v2264_v62  ;;  %1735 = vmatprep.subr.bf16.mxu1 %v2264_v62 }
 0x25a   : > { %v1023_v18 = vpop.permute.xlu1 %1022  ;;  %v1053_v19 = vpop.permute.xlu0 %1052 }
 0x25b   : > { %v1076_v24 = vmax.f32 %v1044_v23, %v1053_v19 }
 0x25e   : > { %v1055_v21 = vpop.permute.xlu1 %1054  ;;  %v1085_v22 = vpop.permute.xlu0 %1084 }
 0x25f   : > { %v1108_v26 = vmax.f32 %v1076_v24, %v1085_v22  ;;  %v2200_v22 = vld [vmem:[%s3187_s8 + $0x8] sm:$0xff]  }
 0x260   : > { %1821 = vmatpush1.bf16.msra.mxu0 %v2200_v22  ;;  %1736 = vmatpush1.bf16.msra.mxu1 %v2200_v22 }
 0x261   : > { %1822 = vmatprep.subr.bf16.mxu0 %v2264_v62  ;;  %1737 = vmatprep.subr.bf16.mxu1 %v2264_v62 }
 0x262   : > { %v1087_v25 = vpop.permute.xlu1 %1086  ;;  %v1117_v10 = vpop.permute.xlu0 %1116 }
 0x263   : > { %v1140_v27 = vmax.f32 %v1108_v26, %v1117_v10 }
 0x266   : > { %v1119_v11 = vpop.permute.xlu1 %1118  ;;  %v1149_v28 = vpop.permute.xlu0 %1148 }
 0x267   : > { %v1172_v29 = vmax.f32 %v1140_v27, %v1149_v28 }
 0x269   : > { %v2790_v32 = vmax.f32 %v1172_v29, %v912_v13 }
 0x26a   : > { %v1151_v34 = vpop.permute.xlu1 %1150  ;;  %v959_v36 = vpop.permute.xlu0 %958 }
 0x26b   : > { %v981_v38 = vmax.f32 %v2608_v7, %v959_v36  ;;  %1196 = vrot.lane.b32.xlu0 %v2790_v32, %s2271_s14  ;;  %v1427_v41 = vsub.f32 %v912_v13, %v2790_v32 }
 0x26d   : > { %v1013_v42 = vmax.f32 %v981_v38, %v991_v15  ;;  %v1444_v6 = vmul.f32 1.442695, %v1427_v41  ;;  %v2202_v38 = vld [vmem:[%s3187_s8 + $0x18] sm:$0xff]  }
 0x26e   : > { %v963_v44 = vpop.permute.xlu1 %962  ;;  %v961_v46 = vpop.permute.xlu0 %960 }
 0x26f   : > { %v1045_v50 = vmax.f32 %v1013_v42, %v1023_v18  ;;  %1220 = vrot.lane.b32.xlu0 %v2790_v32, %s2270_s13  ;;  %2208 = vpow2.f32 %v1444_v6  ;;  %v983_v33 = vmax.f32 %v2657_v48, %v963_v44  ;;  %v982_v27 = vmax.f32 %v2650_v47, %v961_v46 }
 0x271   : > { %v1077_v31 = vmax.f32 %v1045_v50, %v1055_v21 }
 0x272   : > { %v995_v8 = vpop.permute.xlu1 %994  ;;  %v993_v12 = vpop.permute.xlu0 %992 }
 0x273   : > { %v1109_v17 = vmax.f32 %v1077_v31, %v1087_v25  ;;  %1244 = vrot.lane.b32.xlu0 %v2790_v32, %s2269_s12  ;;  %v1015_v28 = vmax.f32 %v983_v33, %v995_v8  ;;  %v1014_v13 = vmax.f32 %v982_v27, %v993_v12  ;;  %v2203_v31 = vld [vmem:[%s3187_s8 + $0x20] sm:$0xff]  }
 0x275   : > { %v1141_v15 = vmax.f32 %v1109_v17, %v1119_v11 }
 0x276   : > { %v1027_v18 = vpop.permute.xlu1 %1026  ;;  %v1025_v19 = vpop.permute.xlu0 %1024 }
 0x277   : > { %v1173_v21 = vmax.f32 %v1141_v15, %v1151_v34  ;;  %1268 = vrot.lane.b32.xlu0 %v2790_v32, %s2268_s10  ;;  %v1047_v41 = vmax.f32 %v1015_v28, %v1027_v18  ;;  %v1046_v42 = vmax.f32 %v1014_v13, %v1025_v19  ;;  %v922_v15 = vadd.f32 %v2614_v35, %v2630_v40  ;;  %v2205_v13 = vld [vmem:[%s3187_s8 + $0x30] sm:$0xff]  }
 0x279   : > { %v2812_v23 = vpop.eup %2208  ;;  %v2814_v24 = vmax.f32 %v1173_v21, %v916_v20 }
 0x27a   : > { %v2818_v25 = vmul.f32 %v2812_v23, %v2667_v53  ;;  %v1059_v10 = vpop.permute.xlu1 %1058  ;;  %v1057_v26 = vpop.permute.xlu0 %1056  ;;  %v2201_v53 = vld [vmem:[%s3187_s8 + $0x10] sm:$0xff]  }
 0x27b   : > { %1292 = vrot.lane.b32.xlu0 %v2790_v32, %s2267_s29  ;;  %1198 = vrot.lane.b32.xlu1 %v2814_v24, %s2271_s14  ;;  %v1429_v11 = vsub.f32 %v916_v20, %v2814_v24  ;;  %v1079_v6 = vmax.f32 %v1047_v41, %v1059_v10  ;;  %v1078_v44 = vmax.f32 %v1046_v42, %v1057_v26  ;;  %v2204_v10 = vld [vmem:[%s3187_s8 + $0x28] sm:$0xff]   ;;  %v2206_v41 = vld [vmem:[%s3187_s8 + $0x38] sm:$0xff]  }
 0x27c   : > { %1823 = vmatpush1.bf16.msra.mxu0 %v2201_v53  ;;  %1738 = vmatpush1.bf16.msra.mxu1 %v2201_v53  ;;  %v926_v20 = vadd.f32 %v2620_v37, %v2630_v40 }
 0x27d   : > { %v1448_v29 = vmul.f32 1.442695, %v1429_v11  ;;  %1824 = vmatprep.subr.bf16.mxu0 %v2264_v62  ;;  %1739 = vmatprep.subr.bf16.mxu1 %v2264_v62 }
 0x27e   : > { %v1091_v34 = vpop.permute.xlu1 %1090  ;;  %v1089_v36 = vpop.permute.xlu0 %1088 }
 0x27f   : > { %1316 = vrot.lane.b32.xlu0 %v2790_v32, %s2265_s27  ;;  %1222 = vrot.lane.b32.xlu1 %v2814_v24, %s2270_s13  ;;  %2210 = vpow2.f32 %v1448_v29  ;;  %v1111_v8 = vmax.f32 %v1079_v6, %v1091_v34  ;;  %v1110_v12 = vmax.f32 %v1078_v44, %v1089_v36  ;;  %v2207_v6 = vld [vmem:[%s3187_s8 + $0x40] sm:$0xff]  }
 0x280   : > { %1825 = vmatpush1.bf16.msra.mxu0 %v2202_v38  ;;  %1740 = vmatpush1.bf16.msra.mxu1 %v2202_v38 }
 0x281   : > { %1826 = vmatprep.subr.bf16.mxu0 %v2264_v62  ;;  %1741 = vmatprep.subr.bf16.mxu1 %v2264_v62 }
 0x282   : > { %v1123_v46 = vpop.permute.xlu1 %1122  ;;  %v1121_v50 = vpop.permute.xlu0 %1120 }
 0x283   : > { %1340 = vrot.lane.b32.xlu0 %v2790_v32, %s2266_s28  ;;  %1246 = vrot.lane.b32.xlu1 %v2814_v24, %s2269_s12  ;;  %v1143_v16 = vmax.f32 %v1111_v8, %v1123_v46  ;;  %v1142_v17 = vmax.f32 %v1110_v12, %v1121_v50 }
 0x284   : > { %1827 = vmatpush1.bf16.msra.mxu0 %v2203_v31  ;;  %1742 = vmatpush1.bf16.msra.mxu1 %v2203_v31 }
 0x285   : > { %1828 = vmatprep.subr.bf16.mxu0 %v2264_v62  ;;  %1743 = vmatprep.subr.bf16.mxu1 %v2264_v62 }
 0x286   : > { %v1155_v18 = vpop.permute.xlu1 %1154  ;;  %v1153_v19 = vpop.permute.xlu0 %1152 }
 0x287   : > { %v1175_v21 = vmax.f32 %v1143_v16, %v1155_v18  ;;  %v1174_v22 = vmax.f32 %v1142_v17, %v1153_v19  ;;  %1270 = vrot.lane.b32.xlu1 %v2814_v24, %s2268_s10 }
 0x288   : > { %1829 = vmatpush1.bf16.msra.mxu0 %v2204_v10  ;;  %1744 = vmatpush1.bf16.msra.mxu1 %v2204_v10 }
 0x289   : > { %v2211_v35 = vpop.eup %2210  ;;  %v2861_v26 = vmax.f32 %v1175_v21, %v926_v20  ;;  %v2863_v33 = vmax.f32 %v1174_v22, %v922_v15  ;;  %1830 = vmatprep.subr.bf16.mxu0 %v2264_v62  ;;  %1745 = vmatprep.subr.bf16.mxu1 %v2264_v62 }
 0x28a   : > { %v1628_v37 = vmul.f32 %v2211_v35, %v2687_v55  ;;  %v967_v27 = vpop.permute.xlu1 %966  ;;  %v965_v11 = vpop.permute.xlu0 %964  ;;  %v1799_v53 = vpack.c.bf16 %v2211_v35, %v2812_v23 }
 0x28b   : > { %1294 = vrot.lane.b32.xlu1 %v2814_v24, %s2267_s29  ;;  %1200 = vrot.lane.b32.xlu0 %v2863_v33, %s2271_s14  ;;  %v1431_v28 = vsub.f32 %v922_v15, %v2863_v33  ;;  %v1433_v23 = vsub.f32 %v926_v20, %v2861_v26  ;;  %v985_v50 = vmax.f32 %v2707_v58, %v967_v27 }
 0x28c   : > { %v1642_v55 = vpack.c.bf16 %v1628_v37, %v2818_v25  ;;  %2077 = vmatprep.mubr.msk.bf16.mxu0 %vm527_vm0, %v1799_v53  ;;  %1831 = vmatpush1.bf16.msra.mxu0 %v2205_v13  ;;  %v984_v31 = vmax.f32 %v2700_v57, %v965_v11 }
 0x28d   : > { %v1452_v29 = vmul.f32 1.442695, %v1431_v28  ;;  %v1456_v38 = vmul.f32 1.442695, %v1433_v23  ;;  %1746 = vmatpush1.bf16.msra.mxu1 %v2205_v13  ;;  %1832 = vmatprep.subr.bf16.mxu0 %v2264_v62  ;;  %v932_v23 = vadd.f32 %v2626_v39, %v2630_v40 }
 0x28e   : > { %v999_v34 = vpop.permute.xlu1 %998  ;;  %2073 = vmatprep.mubr.msk.bf16.mxu1 %vm527_vm0, %v1642_v55  ;;  %v997_v36 = vpop.permute.xlu0 %996  ;;  %1747 = vmatprep.subr.bf16.mxu1 %v2264_v62 }
 0x28f   : > { %1318 = vrot.lane.b32.xlu1 %v2814_v24, %s2265_s27  ;;  %1224 = vrot.lane.b32.xlu0 %v2863_v33, %s2270_s13  ;;  %2212 = vpow2.f32 %v1452_v29  ;;  %v1017_v12 = vmax.f32 %v985_v50, %v999_v34  ;;  %v1016_v16 = vmax.f32 %v984_v31, %v997_v36 }
 0x290   : > { %2214 = vpow2.f32 %v1456_v38  ;;  %1833 = vmatpush1.bf16.msra.mxu0 %v2206_v41 }
 0x291   : > { %1748 = vmatpush1.bf16.msra.mxu1 %v2206_v41  ;;  %1834 = vmatprep.subr.bf16.mxu0 %v2264_v62 }
 0x292   : > { %v1031_v25 = vpop.permute.xlu1 %1030  ;;  %v1029_v42 = vpop.permute.xlu0 %1028  ;;  %1749 = vmatprep.subr.bf16.mxu1 %v2264_v62 }
 0x293   : > { %1342 = vrot.lane.b32.xlu1 %v2814_v24, %s2266_s28  ;;  %1248 = vrot.lane.b32.xlu0 %v2863_v33, %s2269_s12  ;;  %v1049_v19 = vmax.f32 %v1017_v12, %v1031_v25  ;;  %v1048_v20 = vmax.f32 %v1016_v16, %v1029_v42 }
 0x294   : > { %1835 = vmatpush1.bf16.msra.mxu0 %v2207_v6 }
 0x295   : > { %1750 = vmatpush1.bf16.msra.mxu1 %v2207_v6 }
 0x296   : > { %v1063_v44 = vpop.permute.xlu1 %1062  ;;  %v1061_v46 = vpop.permute.xlu0 %1060 }
 0x297   : > { %1202 = vrot.lane.b32.xlu1 %v2861_v26, %s2271_s14  ;;  %1272 = vrot.lane.b32.xlu0 %v2863_v33, %s2268_s10  ;;  %v1081_v10 = vmax.f32 %v1049_v19, %v1063_v44 }
 0x299   : > { %v2905_v8 = vpop.eup %2212 }
 0x29a   : > { %v2907_v17 = vpop.eup %2214  ;;  %v2911_v62 = vmul.f32 %v2905_v8, %v2709_v59  ;;  %v1095_v15 = vpop.permute.xlu1 %1094  ;;  %v1080_v59 = vmax.f32 %v1048_v20, %v1061_v46 }
 0x29b   : > { %v1093_v18 = vpop.permute.xlu0 %1092  ;;  %v2915_v21 = vmul.f32 %v2907_v17, %v2717_v61  ;;  %1226 = vrot.lane.b32.xlu1 %v2861_v26, %s2270_s13  ;;  %1296 = vrot.lane.b32.xlu0 %v2863_v33, %s2267_s29  ;;  %v1801_v22 = vpack.c.bf16 %v2907_v17, %v2905_v8  ;;  %v1113_v11 = vmax.f32 %v1081_v10, %v1095_v15 }
 0x29c   : > { %v1112_v53 = vmax.f32 %v1080_v59, %v1093_v18 }
 0x29d   : > { %v1644_v35 = vpack.c.bf16 %v2915_v21, %v2911_v62 }
 0x29e   : > { %v1127_v37 = vpop.permute.xlu1 %1126 }
 0x29f   : > { %v1125_v27 = vpop.permute.xlu0 %1124  ;;  %1250 = vrot.lane.b32.xlu1 %v2861_v26, %s2269_s12  ;;  %1320 = vrot.lane.b32.xlu0 %v2863_v33, %s2265_s27  ;;  %v1145_v61 = vmax.f32 %v1113_v11, %v1127_v37 }
 0x2a0   : > { %v1144_v28 = vmax.f32 %v1112_v53, %v1125_v27 }
 0x2a2   : > { %v1159_v13 = vpop.permute.xlu1 %1158 }
 0x2a3   : > { %v1157_v55 = vpop.permute.xlu0 %1156  ;;  %v1177_v29 = vmax.f32 %v1145_v61, %v1159_v13  ;;  %1274 = vrot.lane.b32.xlu1 %v2861_v26, %s2268_s10  ;;  %1344 = vrot.lane.b32.xlu0 %v2863_v33, %s2266_s28 }
 0x2a4   : > { %v1176_v34 = vmax.f32 %v1144_v28, %v1157_v55 }
 0x2a5   : > { %v2936_v36 = vmax.f32 %v1177_v29, %v2637_v43 }
 0x2a6   : > { %v2938_v38 = vmax.f32 %v1176_v34, %v932_v23  ;;  %v971_v41 = vpop.permute.xlu1 %970 }
 0x2a7   : > { %v969_v25 = vpop.permute.xlu0 %968  ;;  %1298 = vrot.lane.b32.xlu1 %v2861_v26, %s2267_s29  ;;  %v1437_v40 = vsub.f32 %v2637_v43, %v2936_v36  ;;  %v987_v16 = vmax.f32 %v2660_v49, %v971_v41 }
 0x2a8   : > { %1204 = vrot.lane.b32.xlu0 %v2938_v38, %s2271_s14  ;;  %v1435_v39 = vsub.f32 %v932_v23, %v2938_v38  ;;  %v986_v15 = vmax.f32 %v2644_v9, %v969_v25 }
 0x2a9   : > { %v1464_v46 = vmul.f32 1.442695, %v1437_v40 }
 0x2aa   : > { %v1460_v42 = vmul.f32 1.442695, %v1435_v39  ;;  %v1003_v6 = vpop.permute.xlu1 %1002 }
 0x2ab   : > { %v1001_v44 = vpop.permute.xlu0 %1000  ;;  %1322 = vrot.lane.b32.xlu1 %v2861_v26, %s2265_s27  ;;  %v1019_v19 = vmax.f32 %v987_v16, %v1003_v6 }
 0x2ac   : > { %1228 = vrot.lane.b32.xlu0 %v2938_v38, %s2270_s13  ;;  %2216 = vpow2.f32 %v1460_v42  ;;  %v1018_v20 = vmax.f32 %v986_v15, %v1001_v44 }
 0x2ad   : > { %2218 = vpow2.f32 %v1464_v46 }
 0x2ae   : > { %v1035_v50 = vpop.permute.xlu1 %1034 }
 0x2af   : > { %v1033_v31 = vpop.permute.xlu0 %1032  ;;  %1346 = vrot.lane.b32.xlu1 %v2861_v26, %s2266_s28  ;;  %v1051_v11 = vmax.f32 %v1019_v19, %v1035_v50 }
 0x2b0   : > { %1252 = vrot.lane.b32.xlu0 %v2938_v38, %s2269_s12  ;;  %v1050_v53 = vmax.f32 %v1018_v20, %v1033_v31 }
 0x2b2   : > { %v1067_v43 = vpop.permute.xlu1 %1066 }
 0x2b3   : > { %v1065_v12 = vpop.permute.xlu0 %1064  ;;  %1206 = vrot.lane.b32.xlu1 %v2936_v36, %s2271_s14  ;;  %v1083_v13 = vmax.f32 %v1051_v11, %v1067_v43 }
 0x2b4   : > { %1276 = vrot.lane.b32.xlu0 %v2938_v38, %s2268_s10 }
 0x2b6   : > { %v2961_v18 = vpop.eup %2216  ;;  %v1099_v37 = vpop.permute.xlu1 %1098 }
 0x2b7   : > { %v2963_v10 = vpop.eup %2218  ;;  %v2967_v59 = vmul.f32 %v2961_v18, %v2745_v0  ;;  %v1097_v27 = vpop.permute.xlu0 %1096  ;;  %1230 = vrot.lane.b32.xlu1 %v2936_v36, %s2270_s13  ;;  %v1082_v0 = vmax.f32 %v1050_v53, %v1065_v12  ;;  %v1115_v34 = vmax.f32 %v1083_v13, %v1099_v37 }
 0x2b8   : > { %v2971_v61 = vmul.f32 %v2963_v10, %v2753_v2  ;;  %1300 = vrot.lane.b32.xlu0 %v2938_v38, %s2267_s29  ;;  %v1803_v28 = vpack.c.bf16 %v2963_v10, %v2961_v18 }
 0x2b9   : > { %v1114_v41 = vmax.f32 %v1082_v0, %v1097_v27 }
 0x2ba   : > { %v1646_v55 = vpack.c.bf16 %v2971_v61, %v2967_v59  ;;  %v1131_v23 = vpop.permute.xlu1 %1130 }
 0x2bb   : > { %v1129_v29 = vpop.permute.xlu0 %1128  ;;  %1254 = vrot.lane.b32.xlu1 %v2936_v36, %s2269_s12  ;;  %v1147_v2 = vmax.f32 %v1115_v34, %v1131_v23 }
 0x2bc   : > { %1324 = vrot.lane.b32.xlu0 %v2938_v38, %s2265_s27  ;;  %v1146_v25 = vmax.f32 %v1114_v41, %v1129_v29 }
 0x2be   : > { %v1163_v39 = vpop.permute.xlu1 %1162 }
 0x2bf   : > { %v1161_v40 = vpop.permute.xlu0 %1160  ;;  %v1179_v42 = vmax.f32 %v1147_v2, %v1163_v39  ;;  %1278 = vrot.lane.b32.xlu1 %v2936_v36, %s2268_s10 }
 0x2c0   : > { %v1178_v6 = vmax.f32 %v1146_v25, %v1161_v40  ;;  %1348 = vrot.lane.b32.xlu0 %v2938_v38, %s2266_s28 }
 0x2c1   : > { %v2990_v44 = vmax.f32 %v1179_v42, %v2665_v52 }
 0x2c2   : > { %v2993_v46 = vmax.f32 %v1178_v6, %v2647_v45 }
 0x2c3   : > { %1302 = vrot.lane.b32.xlu1 %v2936_v36, %s2267_s29  ;;  %v1441_v31 = vsub.f32 %v2665_v52, %v2990_v44 }
 0x2c4   : > { %1208 = vrot.lane.b32.xlu0 %v2993_v46, %s2271_s14  ;;  %v1439_v50 = vsub.f32 %v2647_v45, %v2993_v46 }
 0x2c5   : > { %v1472_v12 = vmul.f32 1.442695, %v1441_v31 }
 0x2c6   : > { %v1468_v43 = vmul.f32 1.442695, %v1439_v50 }
 0x2c7   : > { %1326 = vrot.lane.b32.xlu1 %v2936_v36, %s2265_s27 }
 0x2c8   : > { %1232 = vrot.lane.b32.xlu0 %v2993_v46, %s2270_s13  ;;  %2220 = vpow2.f32 %v1468_v43 }
 0x2c9   : > { %2222 = vpow2.f32 %v1472_v12 }
 0x2cb   : > { %1350 = vrot.lane.b32.xlu1 %v2936_v36, %s2266_s28 }
 0x2cc   : > { %1256 = vrot.lane.b32.xlu0 %v2993_v46, %s2269_s12 }
 0x2cf   : > { %1210 = vrot.lane.b32.xlu1 %v2990_v44, %s2271_s14 }
 0x2d0   : > { %1280 = vrot.lane.b32.xlu0 %v2993_v46, %s2268_s10 }
 0x2d2   : > { %v3015_v45 = vpop.eup %2220 }
 0x2d3   : > { %v3017_v52 = vpop.eup %2222  ;;  %v3021_v16 = vmul.f32 %v3015_v45, %v2781_v4  ;;  %1234 = vrot.lane.b32.xlu1 %v2990_v44, %s2270_s13 }
 0x2d4   : > { %v3025_v15 = vmul.f32 %v3017_v52, %v2785_v14  ;;  %1304 = vrot.lane.b32.xlu0 %v2993_v46, %s2267_s29  ;;  %v1805_v19 = vpack.c.bf16 %v3017_v52, %v3015_v45 }
 0x2d6   : > { %v1648_v20 = vpack.c.bf16 %v3025_v15, %v3021_v16 }
 0x2d7   : > { %1258 = vrot.lane.b32.xlu1 %v2990_v44, %s2269_s12 }
 0x2d8   : > { %1328 = vrot.lane.b32.xlu0 %v2993_v46, %s2265_s27 }
 0x2db   : > { %1282 = vrot.lane.b32.xlu1 %v2990_v44, %s2268_s10 }
 0x2dc   : > { %1352 = vrot.lane.b32.xlu0 %v2993_v46, %s2266_s28 }
 0x2dd   : > { %v1197_v4 = vpop.permute.xlu0 %1196 }
 0x2de   : > { %v1364_v29 = vsel %vm527_vm0, %v2790_v32, %v1197_v4 }
 0x2df   : > { %1306 = vrot.lane.b32.xlu1 %v2990_v44, %s2267_s29  ;;  %s3158_s29 = scalar_lea.vmem %s3188_s9, %s2083_s25 }
 0x2e1   : > { %v1221_v14 = vpop.permute.xlu0 %1220 }
 0x2e2   : > { %v1373_v34 = vsel %vm1372_vm2, %v1364_v29, %v1221_v14 }
 0x2e3   : > { %1330 = vrot.lane.b32.xlu1 %v2990_v44, %s2265_s27 }
 0x2e5   : > { %v1245_v37 = vpop.permute.xlu0 %1244 }
 0x2e6   : > { %v1382_v25 = vsel %vm1381_vm5, %v1373_v34, %v1245_v37 }
 0x2e7   : > { %1354 = vrot.lane.b32.xlu1 %v2990_v44, %s2266_s28 }
 0x2e9   : > { %v1269_v27 = vpop.permute.xlu0 %1268 }
 0x2ea   : > { %v1391_v39 = vsel %vm1390_vm6, %v1382_v25, %v1269_v27 }
 0x2ed   : > { %v1199_v11 = vpop.permute.xlu1 %1198  ;;  %v1293_v53 = vpop.permute.xlu0 %1292 }
 0x2ee   : > { %v1400_v40 = vsel %vm1399_vm7, %v1391_v39, %v1293_v53  ;;  %v1365_v31 = vsel %vm527_vm0, %v2814_v24, %v1199_v11 }
 0x2f1   : > { %v1223_v13 = vpop.permute.xlu1 %1222  ;;  %v1317_v0 = vpop.permute.xlu0 %1316 }
 0x2f2   : > { %v1409_v42 = vsel %vm1408_vm8, %v1400_v40, %v1317_v0  ;;  %v1374_v43 = vsel %vm1372_vm2, %v1365_v31, %v1223_v13 }
 0x2f5   : > { %v1247_v23 = vpop.permute.xlu1 %1246  ;;  %v1341_v41 = vpop.permute.xlu0 %1340 }
 0x2f6   : > { %v1418_v32 = vsel %vm1417_vm9, %v1409_v42, %v1341_v41  ;;  %v1383_v37 = vsel %vm1381_vm5, %v1374_v43, %v1247_v23 }
 0x2f7   : > { %v1426_v12 = vsub.f32 %v2597_v30, %v1418_v32 }
 0x2f9   : > { %v1271_v2 = vpop.permute.xlu1 %1270  ;;  %v1442_v0 = vmul.f32 1.442695, %v1426_v12 }
 0x2fa   : > { %v1392_v27 = vsel %vm1390_vm6, %v1383_v37, %v1271_v2 }
 0x2fb   : > { %2224 = vpow2.f32 %v1442_v0 }
 0x2fd   : > { %v1295_v6 = vpop.permute.xlu1 %1294  ;;  %v1201_v50 = vpop.permute.xlu0 %1200 }
 0x2fe   : > { %v1401_v53 = vsel %vm1399_vm7, %v1392_v27, %v1295_v6  ;;  %v1366_v6 = vsel %vm527_vm0, %v2863_v33, %v1201_v50 }
 0x301   : > { %v1319_v4 = vpop.permute.xlu1 %1318  ;;  %v1225_v14 = vpop.permute.xlu0 %1224 }
 0x302   : > { %v1410_v29 = vsel %vm1408_vm8, %v1401_v53, %v1319_v4  ;;  %v1375_v31 = vsel %vm1372_vm2, %v1366_v6, %v1225_v14 }
 0x305   : > { %v1343_v34 = vpop.permute.xlu1 %1342  ;;  %v1249_v41 = vpop.permute.xlu0 %1248 }
 0x306   : > { %v1419_v25 = vsel %vm1417_vm9, %v1410_v29, %v1343_v34  ;;  %v2225_v42 = vpop.eup %2224 }
 0x307   : > { %v1428_v24 = vsub.f32 %v2608_v7, %v1419_v25  ;;  %v1384_v7 = vsel %vm1381_vm5, %v1375_v31, %v1249_v41  ;;  %v1625_v37 = vmul.f32 %v2225_v42, %v2662_v51 }
 0x309   : > { %v1446_v11 = vmul.f32 1.442695, %v1428_v24  ;;  %v1203_v30 = vpop.permute.xlu1 %1202  ;;  %v1273_v13 = vpop.permute.xlu0 %1272 }
 0x30a   : > { %v1393_v53 = vsel %vm1390_vm6, %v1384_v7, %v1273_v13  ;;  %v1367_v51 = vsel %vm527_vm0, %v2861_v26, %v1203_v30 }
 0x30b   : > { %2226 = vpow2.f32 %v1446_v11 }
 0x30d   : > { %v1227_v39 = vpop.permute.xlu1 %1226  ;;  %v1297_v23 = vpop.permute.xlu0 %1296 }
 0x30e   : > { %v1402_v0 = vsel %vm1399_vm7, %v1393_v53, %v1297_v23 }
 0x311   : > { %v1251_v40 = vpop.permute.xlu1 %1250  ;;  %v1321_v2 = vpop.permute.xlu0 %1320 }
 0x312   : > { %v1411_v33 = vsel %vm1408_vm8, %v1402_v0, %v1321_v2 }
 0x315   : > { %v2227_v32 = vpop.eup %2226  ;;  %v1275_v43 = vpop.permute.xlu1 %1274 }
 0x316   : > { %v1345_v12 = vpop.permute.xlu0 %1344  ;;  %v1798_v4 = vpack.c.bf16 %v2227_v32, %v2225_v42  ;;  %v1627_v27 = vmul.f32 %v2227_v32, %v2685_v54  ;;  %v1376_v54 = vsel %vm1372_vm2, %v1367_v51, %v1227_v39 }
 0x317   : > { %v1420_v34 = vsel %vm1417_vm9, %v1411_v33, %v1345_v12  ;;  %v1385_v17 = vsel %vm1381_vm5, %v1376_v54, %v1251_v40 }
 0x318   : > { %1851 = vmatmul.mubr.bf16.vlgmr.msra.gmra.mrb[32].mxu0 %v1798_v4  ;;  %v1641_v29 = vpack.c.bf16 %v1627_v27, %v1625_v37  ;;  %v1430_v41 = vsub.f32 %v2650_v47, %v1420_v34 }
 0x319   : > { %v1299_v50 = vpop.permute.xlu1 %1298  ;;  %2078 = vmatprep.mubr.msk.bf16.mxu0 %vm527_vm0, %v1801_v22  ;;  %v1394_v22 = vsel %vm1390_vm6, %v1385_v17, %v1275_v43 }
 0x31a   : > { %v1205_v14 = vpop.permute.xlu0 %1204  ;;  %1766 = vmatmul.mubr.bf16.vlgmr.msra.gmra.mrb[16].mxu1 %v1641_v29  ;;  %v1403_v24 = vsel %vm1399_vm7, %v1394_v22, %v1299_v50  ;;  %v1450_v11 = vmul.f32 1.442695, %v1430_v41 }
 0x31b   : > { %2074 = vmatprep.mubr.msk.bf16.mxu1 %vm527_vm0, %v1644_v35  ;;  %v1368_v32 = vsel %vm527_vm0, %v2938_v38, %v1205_v14 }
 0x31c   : > { %2228 = vpow2.f32 %v1450_v11 }
 0x31d   : > { %v1323_v25 = vpop.permute.xlu1 %1322 }
 0x31e   : > { %v1229_v8 = vpop.permute.xlu0 %1228  ;;  %v1412_v62 = vsel %vm1408_vm8, %v1403_v24, %v1323_v25 }
 0x31f   : > { %v1377_v43 = vsel %vm1372_vm2, %v1368_v32, %v1229_v8 }
 0x321   : > { %v1347_v21 = vpop.permute.xlu1 %1346 }
 0x322   : > { %v1253_v35 = vpop.permute.xlu0 %1252  ;;  %v1421_v13 = vsel %vm1417_vm9, %v1412_v62, %v1347_v21 }
 0x323   : > { %v1432_v26 = vsub.f32 %v2657_v48, %v1421_v13  ;;  %v1386_v48 = vsel %vm1381_vm5, %v1377_v43, %v1253_v35 }
 0x325   : > { %v1454_v30 = vmul.f32 1.442695, %v1432_v26  ;;  %v1207_v47 = vpop.permute.xlu1 %1206 }
 0x326   : > { %v1277_v39 = vpop.permute.xlu0 %1276  ;;  %v2229_v6 = vpop.eup %2228 }
 0x327   : > { %2230 = vpow2.f32 %v1454_v30  ;;  %v1629_v37 = vmul.f32 %v2229_v6, %v2697_v56  ;;  %v1395_v53 = vsel %vm1390_vm6, %v1386_v48, %v1277_v39  ;;  %v1369_v56 = vsel %vm527_vm0, %v2936_v36, %v1207_v47 }
 0x329   : > { %v1231_v23 = vpop.permute.xlu1 %1230 }
 0x32a   : > { %v1301_v40 = vpop.permute.xlu0 %1300 }
 0x32b   : > { %v1404_v0 = vsel %vm1399_vm7, %v1395_v53, %v1301_v40 }
 0x32d   : > { %v1255_v2 = vpop.permute.xlu1 %1254 }
 0x32e   : > { %v1325_v42 = vpop.permute.xlu0 %1324 }
 0x32f   : > { %v1413_v38 = vsel %vm1408_vm8, %v1404_v0, %v1325_v42 }
 0x331   : > { %v2231_v31 = vpop.eup %2230  ;;  %v1279_v12 = vpop.permute.xlu1 %1278 }
 0x332   : > { %v1349_v7 = vpop.permute.xlu0 %1348  ;;  %v1800_v4 = vpack.c.bf16 %v2231_v31, %v2229_v6  ;;  %v1631_v27 = vmul.f32 %v2231_v31, %v2715_v60  ;;  %v1378_v60 = vsel %vm1372_vm2, %v1369_v56, %v1231_v23 }
 0x333   : > { %v1422_v14 = vsel %vm1417_vm9, %v1413_v38, %v1349_v7  ;;  %v1387_v10 = vsel %vm1381_vm5, %v1378_v60, %v1255_v2 }
 0x334   : > { %1859 = vmatmul.mubr.bf16.gmra.mrb[36].mxu0 %v1800_v4  ;;  %v1643_v29 = vpack.c.bf16 %v1631_v27, %v1629_v37  ;;  %v1434_v34 = vsub.f32 %v2700_v57, %v1422_v14 }
 0x335   : > { %v1303_v33 = vpop.permute.xlu1 %1302  ;;  %2079 = vmatprep.mubr.msk.bf16.mxu0 %vm527_vm0, %v1803_v28  ;;  %v1396_v28 = vsel %vm1390_vm6, %v1387_v10, %v1279_v12 }
 0x336   : > { %v1209_v50 = vpop.permute.xlu0 %1208  ;;  %1774 = vmatmul.mubr.bf16.gmra.mrb[20].mxu1 %v1643_v29  ;;  %v1405_v54 = vsel %vm1399_vm7, %v1396_v28, %v1303_v33  ;;  %v1458_v41 = vmul.f32 1.442695, %v1434_v34 }
 0x337   : > { %2075 = vmatprep.mubr.msk.bf16.mxu1 %vm527_vm0, %v1646_v55  ;;  %v1370_v35 = vsel %vm527_vm0, %v2993_v46, %v1209_v50 }
 0x338   : > { %2232 = vpow2.f32 %v1458_v41 }
 0x339   : > { %v1327_v51 = vpop.permute.xlu1 %1326 }
 0x33a   : > { %v1233_v18 = vpop.permute.xlu0 %1232  ;;  %v1414_v59 = vsel %vm1408_vm8, %v1405_v54, %v1327_v51 }
 0x33b   : > { %v1379_v26 = vsel %vm1372_vm2, %v1370_v35, %v1233_v18 }
 0x33d   : > { %v1351_v61 = vpop.permute.xlu1 %1350 }
 0x33e   : > { %v1257_v55 = vpop.permute.xlu0 %1256  ;;  %v1423_v25 = vsel %vm1417_vm9, %v1414_v59, %v1351_v61 }
 0x33f   : > { %v1436_v36 = vsub.f32 %v2707_v58, %v1423_v25  ;;  %v1388_v47 = vsel %vm1381_vm5, %v1379_v26, %v1257_v55 }
 0x341   : > { %v1462_v8 = vmul.f32 1.442695, %v1436_v36  ;;  %v1211_v57 = vpop.permute.xlu1 %1210 }
 0x342   : > { %v1281_v17 = vpop.permute.xlu0 %1280  ;;  %v2233_v21 = vpop.eup %2232 }
 0x343   : > { %2234 = vpow2.f32 %v1462_v8  ;;  %v1633_v39 = vmul.f32 %v2233_v21, %v2743_v63  ;;  %v1397_v40 = vsel %vm1390_vm6, %v1388_v47, %v1281_v17  ;;  %v1371_v63 = vsel %vm527_vm0, %v2990_v44, %v1211_v57 }
 0x345   : > { %v1235_v22 = vpop.permute.xlu1 %1234 }
 0x346   : > { %v1305_v24 = vpop.permute.xlu0 %1304 }
 0x347   : > { %v1406_v42 = vsel %vm1399_vm7, %v1397_v40, %v1305_v24 }
 0x349   : > { %v1259_v11 = vpop.permute.xlu1 %1258 }
 0x34a   : > { %v1329_v62 = vpop.permute.xlu0 %1328 }
 0x34b   : > { %v1415_v46 = vsel %vm1408_vm8, %v1406_v42, %v1329_v62 }
 0x34d   : > { %v2235_v13 = vpop.eup %2234  ;;  %v1283_v30 = vpop.permute.xlu1 %1282 }
 0x34e   : > { %v1802_v58 = vpack.c.bf16 %v2235_v13, %v2233_v21  ;;  %v1635_v23 = vmul.f32 %v2235_v13, %v2751_v1  ;;  %v1353_v2 = vpop.permute.xlu0 %1352  ;;  %v1380_v1 = vsel %vm1372_vm2, %v1371_v63, %v1235_v22 }
 0x34f   : > { %v1424_v31 = vsel %vm1417_vm9, %v1415_v46, %v1353_v2  ;;  %v1389_v45 = vsel %vm1381_vm5, %v1380_v1, %v1259_v11 }
 0x350   : > { %1867 = vmatmul.mubr.bf16.gmra.mrb[40].mxu0 %v1802_v58  ;;  %v1645_v6 = vpack.c.bf16 %v1635_v23, %v1633_v39  ;;  %v1438_v43 = vsub.f32 %v2644_v9, %v1424_v31  ;;  %v1398_v52 = vsel %vm1390_vm6, %v1389_v45, %v1283_v30 }
 0x351   : > { %v1307_v32 = vpop.permute.xlu1 %1306  ;;  %2080 = vmatprep.mubr.msk.bf16.mxu0 %vm527_vm0, %v1805_v19 }
 0x352   : > { %1782 = vmatmul.mubr.bf16.gmra.mrb[24].mxu1 %v1645_v6  ;;  %v1407_v19 = vsel %vm1399_vm7, %v1398_v52, %v1307_v32  ;;  %v1466_v7 = vmul.f32 1.442695, %v1438_v43 }
 0x353   : > { %2076 = vmatprep.mubr.msk.bf16.mxu1 %vm527_vm0, %v1648_v20 }
 0x354   : > { %2236 = vpow2.f32 %v1466_v7 }
 0x355   : > { %v1331_v12 = vpop.permute.xlu1 %1330 }
 0x356   : > { %v1416_v48 = vsel %vm1408_vm8, %v1407_v19, %v1331_v12 }
 0x359   : > { %v1355_v16 = vpop.permute.xlu1 %1354 }
 0x35a   : > { %v1425_v15 = vsel %vm1417_vm9, %v1416_v48, %v1355_v16 }
 0x35b   : > { %v1440_v20 = vsub.f32 %v2660_v49, %v1425_v15 }
 0x35d   : > { %v1470_v44 = vmul.f32 1.442695, %v1440_v20 }
 0x35e   : > { %v2237_v4 = vpop.eup %2236 }
 0x35f   : > { %2238 = vpow2.f32 %v1470_v44  ;;  %v1637_v27 = vmul.f32 %v2237_v4, %v2779_v3 }
 0x369   : > { %v2239_v9 = vpop.eup %2238 }
 0x36a   : > { %v1804_v37 = vpack.c.bf16 %v2239_v9, %v2237_v4  ;;  %v1639_v53 = vmul.f32 %v2239_v9, %v2783_v5 }
 0x36c   : > { %1875 = vmatmul.mubr.bf16.gmra.mrb[44].mxu0 %v1804_v37  ;;  %v1647_v0 = vpack.c.bf16 %v1639_v53, %v1637_v27 }
 0x36e   : > { %1790 = vmatmul.mubr.bf16.gmra.mrb[28].mxu1 %v1647_v0 }
 0x3eb   : > { %v1852_v29 = vpop.f32.mrb[32].mxu0 }
 0x3ec   : > { %2240 = vrcp.f32 %v1852_v29  ;;  %v1854_v38 = vpop.f32.mrb[33].mxu0 }
 0x3ed   : > { %v1767_v33 = vpop.f32.mrb[16].mxu1  ;;  %v1855_v50 = vpop.f32.mrb[34].mxu0 }
 0x3ee   : > { %2242 = vrcp.f32 %v1855_v50  ;;  %v1769_v49 = vpop.f32.mrb[17].mxu1  ;;  %v1857_v14 = vpop.f32.mrb[35].mxu0 }
 0x3ef   : > { %v1770_v56 = vpop.f32.mrb[18].mxu1 }
 0x3f0   : > { %v1772_v60 = vpop.f32.mrb[19].mxu1 }
 0x3f6   : > { %v2241_v34 = vpop.eup %2240 }
 0x3f7   : > { %v1884_v3 = vmul.f32 %v2241_v34, %v1767_v33 }
 0x3f8   : > { %v2243_v5 = vpop.eup %2242 }
 0x3f9   : > { %1899 = vst.msk [vmem:[%s3158_s29] sm:$0xff] %vm527_vm0, %v1884_v3  ;;  %v1886_v51 = vmul.f32 %v2243_v5, %v1770_v56 }
 0x3fb   : > { %1900 = vst.msk [vmem:[%s3158_s29 + $0x8] sm:$0xff] %vm527_vm0, %v1886_v51 }
 0x407   : > { %v1860_v18 = vpop.f32.mrb[36].mxu0 }
 0x408   : > { %2244 = vrcp.f32 %v1860_v18  ;;  %v1862_v10 = vpop.f32.mrb[37].mxu0 }
 0x409   : > { %v1775_v28 = vpop.f32.mrb[20].mxu1  ;;  %v1863_v54 = vpop.f32.mrb[38].mxu0 }
 0x40a   : > { %2246 = vrcp.f32 %v1863_v54  ;;  %v1777_v41 = vpop.f32.mrb[21].mxu1  ;;  %v1865_v59 = vpop.f32.mrb[39].mxu0 }
 0x40b   : > { %v1778_v61 = vpop.f32.mrb[22].mxu1 }
 0x40c   : > { %v1780_v55 = vpop.f32.mrb[23].mxu1 }
 0x412   : > { %v2245_v25 = vpop.eup %2244 }
 0x413   : > { %v1888_v36 = vmul.f32 %v2245_v25, %v1775_v28 }
 0x414   : > { %v2247_v8 = vpop.eup %2246 }
 0x415   : > { %1901 = vst.msk [vmem:[%s3158_s29 + $0x10] sm:$0xff] %vm527_vm0, %v1888_v36  ;;  %v1890_v57 = vmul.f32 %v2247_v8, %v1778_v61 }
 0x417   : > { %1902 = vst.msk [vmem:[%s3158_s29 + $0x18] sm:$0xff] %vm527_vm0, %v1890_v57 }
 0x423   : > { %v1868_v17 = vpop.f32.mrb[40].mxu0 }
 0x424   : > { %2248 = vrcp.f32 %v1868_v17  ;;  %v1870_v22 = vpop.f32.mrb[41].mxu0 }
 0x425   : > { %v1783_v24 = vpop.f32.mrb[24].mxu1  ;;  %v1871_v11 = vpop.f32.mrb[42].mxu0 }
 0x426   : > { %2250 = vrcp.f32 %v1871_v11  ;;  %v1785_v62 = vpop.f32.mrb[25].mxu1  ;;  %v1873_v21 = vpop.f32.mrb[43].mxu0 }
 0x427   : > { %v1786_v35 = vpop.f32.mrb[26].mxu1 }
 0x428   : > { %v1788_v13 = vpop.f32.mrb[27].mxu1 }
 0x42e   : > { %v2249_v26 = vpop.eup %2248 }
 0x42f   : > { %v1892_v30 = vmul.f32 %v2249_v26, %v1783_v24 }
 0x430   : > { %v2251_v47 = vpop.eup %2250 }
 0x431   : > { %1903 = vst.msk [vmem:[%s3158_s29 + $0x20] sm:$0xff] %vm527_vm0, %v1892_v30  ;;  %v1894_v58 = vmul.f32 %v2251_v47, %v1786_v35 }
 0x433   : > { %1904 = vst.msk [vmem:[%s3158_s29 + $0x28] sm:$0xff] %vm527_vm0, %v1894_v58 }
 0x43f   : > { %v1876_v39 = vpop.f32.mrb[44].mxu0 }
 0x440   : > { %2252 = vrcp.f32 %v1876_v39  ;;  %v1878_v23 = vpop.f32.mrb[45].mxu0 }
 0x441   : > { %v1791_v40 = vpop.f32.mrb[28].mxu1  ;;  %v1879_v2 = vpop.f32.mrb[46].mxu0 }
 0x442   : > { %2254 = vrcp.f32 %v1879_v2  ;;  %v1793_v42 = vpop.f32.mrb[29].mxu1  ;;  %v1881_v6 = vpop.f32.mrb[47].mxu0 }
 0x443   : > { %v1794_v46 = vpop.f32.mrb[30].mxu1 }
 0x444   : > { %v1796_v32 = vpop.f32.mrb[31].mxu1 }
 0x44a   : > { %v2253_v31 = vpop.eup %2252 }
 0x44b   : > { %v1896_v63 = vmul.f32 %v2253_v31, %v1791_v40 }
 0x44c   : > { %v2255_v1 = vpop.eup %2254 }
 0x44d   : > { %1905 = vst.msk [vmem:[%s3158_s29 + $0x30] sm:$0xff] %vm527_vm0, %v1896_v63  ;;  %v1898_v43 = vmul.f32 %v2255_v1, %v1794_v46 }
 0x44f   : > { %1906 = vst.msk [vmem:[%s3158_s29 + $0x38] sm:$0xff] %vm527_vm0, %v1898_v43 }
 0x450 PF: > { %s20_s11 = sadd.s32 1, %s2262_s11  }
 0x451   : > { %p17_p4 = scmp.ge.s32.totalorder %s20_s11, 4  }
 0x453   :  { %19 = sbr.rel (!%p17_p4) target bundleno = 2 (0x2), region = 89 }

// kernel: _lambda_.3
= control target key start
LH: loop header
LB: loop body
LE: loop exit
PB: predicated region body
PF: predicated region fallthrough
CT: control target
= control target key end

     0   :  { %s918_s17 = smov 0   ;;  %s1119_s0 = inlined_call_operand.vmem [shape: bf16[512,36], index: 0, kind: input, shape index: {}]   ;;  %s1120_s1 = inlined_call_operand.vmem [shape: bf16[36,8], index: 1, kind: input, shape index: {}]   ;;  %s1121_s2 = inlined_call_operand.vmem [shape: f32[1,8], index: 2, kind: input, shape index: {}]   ;;  %s1122_s3 = inlined_call_operand.<no memory space> [shape: f32[1,1], index: 3, kind: input, shape index: {}]   ;;  %s1123_s4 = inlined_call_operand.vmem [shape: f32[512,8], index: 4, kind: output, shape index: {}]  }
   0x1   :  { %9 = sst [smem:[#allocation2]] %s1122_s3 }
   0x2 LB: > { %s743_s18 = sadd.s32 4294967295, %s888_s17   ;;  %p747_p0 = scmp.ge.s32.totalorder %s888_s17, 1  ;;  %s888_s17 = sphi %s918_s17, %s15_s17  }
   0x3   : > { %p164_p1 = scmp.lt.s32.totalorder %s888_s17, 3 }
   0x5   : > { %p165_p2 = pnand %p747_p0, %p164_p1 }
   0x6   : > { %v863_v0 = vld [vmem:[%s1120_s1] sm:$0xff] (!%p165_p2)   ;;  %v864_v1 = vld [vmem:[%s1120_s1 + $0x8] sm:$0xff] (!%p165_p2)   ;;  %s748_s22 = sshll.u32 (!%p165_p2), %s743_s18, 5  ;;  %v865_v2 = vld [vmem:[%s1120_s1 + $0x10] ss:$0 sps:$4 sm:$0x33] (!%p165_p2)  }
   0x7   : > { %168 = sbr.rel (%p165_p2) target bundleno = 267 (0x10b), region = 36  ;;  %809 = vmatprep.subr.bf16.mxu0 (!%p165_p2), %v863_v0  ;;  %847 = vmatprep.subr.bf16.mxu1 (!%p165_p2), %v863_v0  ;;  %p191_p3 = scmp.lt.s32.totalorder (!%p165_p2), %s748_s22, 63  ;;  %vm391_vm0 = vcmask (!%p165_p2), 1041408   ;;  %vm342_vm1 = vcmask (!%p165_p2), 293888   ;;  %v978_v20 = vld [vmem:[%s1121_s2] ss:$0 sm:$0xff] (!%p165_p2) }
   0x8   : > { %810 = vmatpush3.bf16.msra.mxu0 (!%p165_p2), %v863_v0  ;;  %850 = vmatpush3.bf16.msra.mxu1 (!%p165_p2), %v863_v0  ;;  %v393_v3 = vsel (!%p165_p2), %vm391_vm0, %v865_v2, 0  ;;  %s556_s29 = sld [smem:[#allocation2]] (!%p165_p2)  ;;  %vm654_vm2 = vcmask (!%p165_p2), 64512  }
   0x9   : > { %811 = vmatprep.subr.bf16.mxu0 (!%p165_p2), %v864_v1  ;;  %848 = vmatprep.subr.bf16.mxu1 (!%p165_p2), %v864_v1 }
   0xc   : > { %812 = vmatpush3.bf16.msra.mxu0 (!%p165_p2), %v864_v1  ;;  %851 = vmatpush3.bf16.msra.mxu1 (!%p165_p2), %v864_v1 }
   0xd   : > { %853 = vmatprep.subr.msk.bf16.mxu0 (!%p165_p2), %vm391_vm0, %v865_v2  ;;  %854 = vmatprep.subr.msk.bf16.mxu1 (!%p165_p2), %vm391_vm0, %v865_v2 }
   0xe   : > { %s1125_s22 = smov (!%p191_p3, %s748_s22), 63  ;;  %v981_v22 = vstv %s556_s29 }
   0xf   : > { %s749_s25 = sshll.u32 %s1125_s22, 2  ;;  %s751_s6 = sshll.u32 %s1125_s22, 3 }
  0x10   : > { %s941_s28 = scalar_lea.vmem %s1119_s0, %s749_s25  ;;  %814 = vmatpush3.bf16.msra.mxu0 %v393_v3  ;;  %852 = vmatpush3.bf16.msra.mxu1 %v393_v3  ;;  %s990_s9 = scalar_lea.vmem %s1123_s4, %s751_s6 }
  0x11   : > { %v866_v4 = vld [vmem:[%s941_s28] sm:$0xff]   ;;  %v868_v6 = vld [vmem:[%s941_s28 + $0x8] sm:$0xff]   ;;  %v870_v8 = vld [vmem:[%s941_s28 + $0x10] sm:$0xff]  }
  0x12   : > { %v867_v5 = vld [vmem:[%s941_s28 + $0x40] sm:$0xff]   ;;  %815 = vmatprep.mubr.msk.bf16.mxu0 %vm342_vm1, %v866_v4  ;;  %v869_v7 = vld [vmem:[%s941_s28 + $0x48] sm:$0xff]   ;;  %v871_v9 = vld [vmem:[%s941_s28 + $0x50] sm:$0xff]  }
  0x13   : > { %831 = vmatprep.mubr.msk.bf16.mxu1 %vm342_vm1, %v867_v5  ;;  %816 = vmatmul.mubr.msk.bf16.vlgmr.msra.gmra.mrb[0].mxu0 %vm342_vm1, %v868_v6  ;;  %v872_v10 = vld [vmem:[%s941_s28 + $0x18] sm:$0xff]   ;;  %v874_v12 = vld [vmem:[%s941_s28 + $0x20] sm:$0xff]   ;;  %v876_v14 = vld [vmem:[%s941_s28 + $0x28] sm:$0xff]  }
  0x14   : > { %832 = vmatmul.mubr.msk.bf16.vlgmr.msra.gmra.mrb[0].mxu1 %vm342_vm1, %v869_v7  ;;  %819 = vmatprep.mubr.msk.bf16.mxu0 %vm342_vm1, %v870_v8  ;;  %v873_v11 = vld [vmem:[%s941_s28 + $0x58] sm:$0xff]   ;;  %v875_v13 = vld [vmem:[%s941_s28 + $0x60] sm:$0xff]   ;;  %v877_v15 = vld [vmem:[%s941_s28 + $0x68] sm:$0xff]  }
  0x15   : > { %835 = vmatprep.mubr.msk.bf16.mxu1 %vm342_vm1, %v871_v9  ;;  %v878_v16 = vld [vmem:[%s941_s28 + $0x30] sm:$0xff]   ;;  %v880_v18 = vld [vmem:[%s941_s28 + $0x38] sm:$0xff]  }
  0x16   : > { %v879_v17 = vld [vmem:[%s941_s28 + $0x70] sm:$0xff]   ;;  %v881_v19 = vld [vmem:[%s941_s28 + $0x78] sm:$0xff]  }
  0x1b   : > { %820 = vmatmul.mubr.msk.bf16.gmra.mrb[4].mxu0 %vm342_vm1, %v872_v10 }
  0x1c   : > { %836 = vmatmul.mubr.msk.bf16.gmra.mrb[4].mxu1 %vm342_vm1, %v873_v11  ;;  %823 = vmatprep.mubr.msk.bf16.mxu0 %vm342_vm1, %v874_v12 }
  0x1d   : > { %839 = vmatprep.mubr.msk.bf16.mxu1 %vm342_vm1, %v875_v13 }
  0x23   : > { %824 = vmatmul.mubr.msk.bf16.gmra.mrb[8].mxu0 %vm342_vm1, %v876_v14 }
  0x24   : > { %840 = vmatmul.mubr.msk.bf16.gmra.mrb[8].mxu1 %vm342_vm1, %v877_v15  ;;  %827 = vmatprep.mubr.msk.bf16.mxu0 %vm342_vm1, %v878_v16 }
  0x25   : > { %843 = vmatprep.mubr.msk.bf16.mxu1 %vm342_vm1, %v879_v17 }
  0x2b   : > { %828 = vmatmul.mubr.msk.bf16.gmra.mrb[12].mxu0 %vm342_vm1, %v880_v18 }
  0x2c   : > { %844 = vmatmul.mubr.msk.bf16.gmra.mrb[12].mxu1 %vm342_vm1, %v881_v19 }
  0xe6   : > { %v817_v21 = vpop.f32.mrb[0].mxu0 }
  0xe7   : > { %v833_v23 = vpop.f32.mrb[0].mxu1  ;;  %v438_v24 = vadd.f32 %v817_v21, %v978_v20  ;;  %v429_v26 = vpop.f32.mrb[1].mxu0 }
  0xe8   : > { %v502_v25 = vadd.f32 %v833_v23, %v978_v20  ;;  %v493_v27 = vpop.f32.mrb[1].mxu1  ;;  %v430_v28 = vadd.f32 %v978_v20, %v429_v26  ;;  %v818_v30 = vpop.f32.mrb[2].mxu0 }
  0xe9   : > { %v494_v29 = vadd.f32 %v978_v20, %v493_v27  ;;  %v834_v31 = vpop.f32.mrb[2].mxu1  ;;  %vm559_vm3 = vcmp.ge.f32.partialorder %v438_v24, 0.0  ;;  %v592_v32 = vmul.f32 %v981_v22, %v438_v24  ;;  %v432_v34 = vpop.f32.mrb[3].mxu0  ;;  %v441_v40 = vadd.f32 %v818_v30, %v978_v20 }
  0xea   : > { %vm575_vm4 = vcmp.ge.f32.partialorder %v502_v25, 0.0  ;;  %v608_v33 = vmul.f32 %v981_v22, %v502_v25  ;;  %v496_v35 = vpop.f32.mrb[3].mxu1  ;;  %vm557_vm5 = vcmp.ge.f32.partialorder %v430_v28, 0.0  ;;  %v590_v36 = vmul.f32 %v981_v22, %v430_v28 }
  0xeb   : > { %vm573_vm6 = vcmp.ge.f32.partialorder %v494_v29, 0.0  ;;  %v606_v37 = vmul.f32 %v981_v22, %v494_v29  ;;  %v624_v38 = vsel %vm559_vm3, %v438_v24, %v592_v32  ;;  %v505_v41 = vadd.f32 %v834_v31, %v978_v20 }
  0xec   : > { %v640_v39 = vsel %vm575_vm4, %v502_v25, %v608_v33  ;;  %657 = vst.msk [vmem:[%s990_s9 + $0x10] sm:$0xff] %vm654_vm2, %v624_v38  ;;  %v622_v42 = vsel %vm557_vm5, %v430_v28, %v590_v36  ;;  %v433_v44 = vadd.f32 %v978_v20, %v432_v34  ;;  %v497_v45 = vadd.f32 %v978_v20, %v496_v35 }
  0xed   : > { %673 = vst.msk [vmem:[%s990_s9 + $0x90] sm:$0xff] %vm654_vm2, %v640_v39  ;;  %v638_v43 = vsel %vm573_vm6, %v494_v29, %v606_v37  ;;  %655 = vst.msk [vmem:[%s990_s9] sm:$0xff] %vm654_vm2, %v622_v42  ;;  %vm560_vm7 = vcmp.ge.f32.partialorder %v441_v40, 0.0  ;;  %v593_v46 = vmul.f32 %v981_v22, %v441_v40  ;;  %vm576_vm8 = vcmp.ge.f32.partialorder %v505_v41, 0.0 }
  0xee   : > { %671 = vst.msk [vmem:[%s990_s9 + $0x80] sm:$0xff] %vm654_vm2, %v638_v43  ;;  %v609_v47 = vmul.f32 %v981_v22, %v505_v41  ;;  %vm558_vm9 = vcmp.ge.f32.partialorder %v433_v44, 0.0  ;;  %v591_v48 = vmul.f32 %v981_v22, %v433_v44  ;;  %vm574_vm10 = vcmp.ge.f32.partialorder %v497_v45, 0.0  ;;  %v821_v50 = vpop.f32.mrb[4].mxu0 }
  0xef   : > { %v607_v49 = vmul.f32 %v981_v22, %v497_v45  ;;  %v837_v51 = vpop.f32.mrb[4].mxu1  ;;  %v625_v52 = vsel %vm560_vm7, %v441_v40, %v593_v46  ;;  %v454_v54 = vadd.f32 %v821_v50, %v978_v20  ;;  %v445_v56 = vpop.f32.mrb[5].mxu0 }
  0xf0   : > { %v641_v53 = vsel %vm576_vm8, %v505_v41, %v609_v47  ;;  %v518_v55 = vadd.f32 %v837_v51, %v978_v20  ;;  %v509_v57 = vpop.f32.mrb[5].mxu1  ;;  %658 = vst.msk [vmem:[%s990_s9 + $0x18] sm:$0xff] %vm654_vm2, %v625_v52  ;;  %v623_v58 = vsel %vm558_vm9, %v433_v44, %v591_v48  ;;  %v446_v60 = vadd.f32 %v978_v20, %v445_v56  ;;  %v822_v62 = vpop.f32.mrb[6].mxu0 }
  0xf1   : > { %674 = vst.msk [vmem:[%s990_s9 + $0x98] sm:$0xff] %vm654_vm2, %v641_v53  ;;  %v639_v59 = vsel %vm574_vm10, %v497_v45, %v607_v49  ;;  %v510_v61 = vadd.f32 %v978_v20, %v509_v57  ;;  %v838_v63 = vpop.f32.mrb[6].mxu1  ;;  %656 = vst.msk [vmem:[%s990_s9 + $0x8] sm:$0xff] %vm654_vm2, %v623_v58  ;;  %vm563_vm11 = vcmp.ge.f32.partialorder %v454_v54, 0.0  ;;  %v596_v0 = vmul.f32 %v981_v22, %v454_v54  ;;  %v448_v2 = vpop.f32.mrb[7].mxu0 }
  0xf2   : > { %672 = vst.msk [vmem:[%s990_s9 + $0x88] sm:$0xff] %vm654_vm2, %v639_v59  ;;  %vm579_vm12 = vcmp.ge.f32.partialorder %v518_v55, 0.0  ;;  %v612_v1 = vmul.f32 %v981_v22, %v518_v55  ;;  %v512_v3 = vpop.f32.mrb[7].mxu1  ;;  %vm561_vm13 = vcmp.ge.f32.partialorder %v446_v60, 0.0  ;;  %v594_v4 = vmul.f32 %v981_v22, %v446_v60 }
  0xf3   : > { %vm577_vm14 = vcmp.ge.f32.partialorder %v510_v61, 0.0  ;;  %v610_v5 = vmul.f32 %v981_v22, %v510_v61  ;;  %v628_v6 = vsel %vm563_vm11, %v454_v54, %v596_v0  ;;  %v457_v8 = vadd.f32 %v822_v62, %v978_v20 }
  0xf4   : > { %v644_v7 = vsel %vm579_vm12, %v518_v55, %v612_v1  ;;  %v521_v9 = vadd.f32 %v838_v63, %v978_v20  ;;  %661 = vst.msk [vmem:[%s990_s9 + $0x30] sm:$0xff] %vm654_vm2, %v628_v6  ;;  %v626_v10 = vsel %vm561_vm13, %v446_v60, %v594_v4  ;;  %v449_v12 = vadd.f32 %v978_v20, %v448_v2 }
  0xf5   : > { %677 = vst.msk [vmem:[%s990_s9 + $0xb0] sm:$0xff] %vm654_vm2, %v644_v7  ;;  %v642_v11 = vsel %vm577_vm14, %v510_v61, %v610_v5  ;;  %v513_v13 = vadd.f32 %v978_v20, %v512_v3  ;;  %659 = vst.msk [vmem:[%s990_s9 + $0x20] sm:$0xff] %vm654_vm2, %v626_v10  ;;  %vm564_vm15 = vcmp.ge.f32.partialorder %v457_v8, 0.0  ;;  %v597_v14 = vmul.f32 %v981_v22, %v457_v8 }
  0xf6   : > { %675 = vst.msk [vmem:[%s990_s9 + $0xa0] sm:$0xff] %vm654_vm2, %v642_v11  ;;  %vm580_vm0 = vcmp.ge.f32.partialorder %v521_v9, 0.0  ;;  %v613_v15 = vmul.f32 %v981_v22, %v521_v9  ;;  %vm562_vm1 = vcmp.ge.f32.partialorder %v449_v12, 0.0  ;;  %v595_v16 = vmul.f32 %v981_v22, %v449_v12  ;;  %v825_v18 = vpop.f32.mrb[8].mxu0 }
  0xf7   : > { %vm578_vm3 = vcmp.ge.f32.partialorder %v513_v13, 0.0  ;;  %v611_v17 = vmul.f32 %v981_v22, %v513_v13  ;;  %v841_v19 = vpop.f32.mrb[8].mxu1  ;;  %v629_v21 = vsel %vm564_vm15, %v457_v8, %v597_v14  ;;  %v470_v24 = vadd.f32 %v825_v18, %v978_v20  ;;  %v461_v26 = vpop.f32.mrb[9].mxu0 }
  0xf8   : > { %v645_v23 = vsel %vm580_vm0, %v521_v9, %v613_v15  ;;  %v534_v25 = vadd.f32 %v841_v19, %v978_v20  ;;  %v525_v27 = vpop.f32.mrb[9].mxu1  ;;  %662 = vst.msk [vmem:[%s990_s9 + $0x38] sm:$0xff] %vm654_vm2, %v629_v21  ;;  %v627_v28 = vsel %vm562_vm1, %v449_v12, %v595_v16  ;;  %v462_v30 = vadd.f32 %v978_v20, %v461_v26  ;;  %v826_v32 = vpop.f32.mrb[10].mxu0 }
  0xf9   : > { %678 = vst.msk [vmem:[%s990_s9 + $0xb8] sm:$0xff] %vm654_vm2, %v645_v23  ;;  %v643_v29 = vsel %vm578_vm3, %v513_v13, %v611_v17  ;;  %v526_v31 = vadd.f32 %v978_v20, %v525_v27  ;;  %v842_v33 = vpop.f32.mrb[10].mxu1  ;;  %660 = vst.msk [vmem:[%s990_s9 + $0x28] sm:$0xff] %vm654_vm2, %v627_v28  ;;  %vm567_vm4 = vcmp.ge.f32.partialorder %v470_v24, 0.0  ;;  %v600_v34 = vmul.f32 %v981_v22, %v470_v24  ;;  %v464_v36 = vpop.f32.mrb[11].mxu0 }
  0xfa   : > { %676 = vst.msk [vmem:[%s990_s9 + $0xa8] sm:$0xff] %vm654_vm2, %v643_v29  ;;  %vm583_vm5 = vcmp.ge.f32.partialorder %v534_v25, 0.0  ;;  %v616_v35 = vmul.f32 %v981_v22, %v534_v25  ;;  %v528_v37 = vpop.f32.mrb[11].mxu1  ;;  %vm565_vm6 = vcmp.ge.f32.partialorder %v462_v30, 0.0  ;;  %v598_v38 = vmul.f32 %v981_v22, %v462_v30 }
  0xfb   : > { %vm581_vm7 = vcmp.ge.f32.partialorder %v526_v31, 0.0  ;;  %v614_v39 = vmul.f32 %v981_v22, %v526_v31  ;;  %v632_v40 = vsel %vm567_vm4, %v470_v24, %v600_v34  ;;  %v473_v42 = vadd.f32 %v826_v32, %v978_v20 }
  0xfc   : > { %v648_v41 = vsel %vm583_vm5, %v534_v25, %v616_v35  ;;  %v537_v43 = vadd.f32 %v842_v33, %v978_v20  ;;  %665 = vst.msk [vmem:[%s990_s9 + $0x50] sm:$0xff] %vm654_vm2, %v632_v40  ;;  %v630_v44 = vsel %vm565_vm6, %v462_v30, %v598_v38  ;;  %v465_v46 = vadd.f32 %v978_v20, %v464_v36 }
  0xfd   : > { %681 = vst.msk [vmem:[%s990_s9 + $0xd0] sm:$0xff] %vm654_vm2, %v648_v41  ;;  %v646_v45 = vsel %vm581_vm7, %v526_v31, %v614_v39  ;;  %v529_v47 = vadd.f32 %v978_v20, %v528_v37  ;;  %663 = vst.msk [vmem:[%s990_s9 + $0x40] sm:$0xff] %vm654_vm2, %v630_v44  ;;  %vm568_vm8 = vcmp.ge.f32.partialorder %v473_v42, 0.0  ;;  %v601_v48 = vmul.f32 %v981_v22, %v473_v42 }
  0xfe   : > { %679 = vst.msk [vmem:[%s990_s9 + $0xc0] sm:$0xff] %vm654_vm2, %v646_v45  ;;  %vm584_vm9 = vcmp.ge.f32.partialorder %v537_v43, 0.0  ;;  %v617_v49 = vmul.f32 %v981_v22, %v537_v43  ;;  %vm566_vm10 = vcmp.ge.f32.partialorder %v465_v46, 0.0  ;;  %v599_v50 = vmul.f32 %v981_v22, %v465_v46  ;;  %v829_v52 = vpop.f32.mrb[12].mxu0 }
  0xff   : > { %vm582_vm11 = vcmp.ge.f32.partialorder %v529_v47, 0.0  ;;  %v615_v51 = vmul.f32 %v981_v22, %v529_v47  ;;  %v845_v53 = vpop.f32.mrb[12].mxu1  ;;  %v633_v54 = vsel %vm568_vm8, %v473_v42, %v601_v48  ;;  %v486_v56 = vadd.f32 %v829_v52, %v978_v20  ;;  %v477_v58 = vpop.f32.mrb[13].mxu0 }
 0x100   : > { %v649_v55 = vsel %vm584_vm9, %v537_v43, %v617_v49  ;;  %v550_v57 = vadd.f32 %v845_v53, %v978_v20  ;;  %v541_v59 = vpop.f32.mrb[13].mxu1  ;;  %666 = vst.msk [vmem:[%s990_s9 + $0x58] sm:$0xff] %vm654_vm2, %v633_v54  ;;  %v631_v60 = vsel %vm566_vm10, %v465_v46, %v599_v50  ;;  %v478_v62 = vadd.f32 %v978_v20, %v477_v58  ;;  %v830_v0 = vpop.f32.mrb[14].mxu0 }
 0x101   : > { %682 = vst.msk [vmem:[%s990_s9 + $0xd8] sm:$0xff] %vm654_vm2, %v649_v55  ;;  %v647_v61 = vsel %vm582_vm11, %v529_v47, %v615_v51  ;;  %v542_v63 = vadd.f32 %v978_v20, %v541_v59  ;;  %v846_v1 = vpop.f32.mrb[14].mxu1  ;;  %664 = vst.msk [vmem:[%s990_s9 + $0x48] sm:$0xff] %vm654_vm2, %v631_v60  ;;  %vm571_vm12 = vcmp.ge.f32.partialorder %v486_v56, 0.0  ;;  %v604_v2 = vmul.f32 %v981_v22, %v486_v56  ;;  %v480_v4 = vpop.f32.mrb[15].mxu0 }
 0x102   : > { %680 = vst.msk [vmem:[%s990_s9 + $0xc8] sm:$0xff] %vm654_vm2, %v647_v61  ;;  %vm587_vm13 = vcmp.ge.f32.partialorder %v550_v57, 0.0  ;;  %v620_v3 = vmul.f32 %v981_v22, %v550_v57  ;;  %v544_v5 = vpop.f32.mrb[15].mxu1  ;;  %vm569_vm14 = vcmp.ge.f32.partialorder %v478_v62, 0.0  ;;  %v602_v6 = vmul.f32 %v981_v22, %v478_v62 }
 0x103   : > { %vm585_vm15 = vcmp.ge.f32.partialorder %v542_v63, 0.0  ;;  %v618_v7 = vmul.f32 %v981_v22, %v542_v63  ;;  %v636_v8 = vsel %vm571_vm12, %v486_v56, %v604_v2  ;;  %v489_v10 = vadd.f32 %v830_v0, %v978_v20 }
 0x104   : > { %v652_v9 = vsel %vm587_vm13, %v550_v57, %v620_v3  ;;  %v553_v11 = vadd.f32 %v846_v1, %v978_v20  ;;  %669 = vst.msk [vmem:[%s990_s9 + $0x70] sm:$0xff] %vm654_vm2, %v636_v8  ;;  %v634_v12 = vsel %vm569_vm14, %v478_v62, %v602_v6  ;;  %v481_v14 = vadd.f32 %v978_v20, %v480_v4 }
 0x105   : > { %685 = vst.msk [vmem:[%s990_s9 + $0xf0] sm:$0xff] %vm654_vm2, %v652_v9  ;;  %v650_v13 = vsel %vm585_vm15, %v542_v63, %v618_v7  ;;  %v545_v15 = vadd.f32 %v978_v20, %v544_v5  ;;  %667 = vst.msk [vmem:[%s990_s9 + $0x60] sm:$0xff] %vm654_vm2, %v634_v12  ;;  %vm572_vm0 = vcmp.ge.f32.partialorder %v489_v10, 0.0  ;;  %v605_v16 = vmul.f32 %v981_v22, %v489_v10 }
 0x106   : > { %683 = vst.msk [vmem:[%s990_s9 + $0xe0] sm:$0xff] %vm654_vm2, %v650_v13  ;;  %vm588_vm1 = vcmp.ge.f32.partialorder %v553_v11, 0.0  ;;  %v621_v17 = vmul.f32 %v981_v22, %v553_v11  ;;  %vm570_vm3 = vcmp.ge.f32.partialorder %v481_v14, 0.0  ;;  %v603_v18 = vmul.f32 %v981_v22, %v481_v14 }
 0x107   : > { %vm586_vm4 = vcmp.ge.f32.partialorder %v545_v15, 0.0  ;;  %v619_v19 = vmul.f32 %v981_v22, %v545_v15  ;;  %v637_v21 = vsel %vm572_vm0, %v489_v10, %v605_v16 }
 0x108   : > { %v653_v20 = vsel %vm588_vm1, %v553_v11, %v621_v17  ;;  %670 = vst.msk [vmem:[%s990_s9 + $0x78] sm:$0xff] %vm654_vm2, %v637_v21  ;;  %v635_v23 = vsel %vm570_vm3, %v481_v14, %v603_v18 }
 0x109   : > { %686 = vst.msk [vmem:[%s990_s9 + $0xf8] sm:$0xff] %vm654_vm2, %v653_v20  ;;  %v651_v24 = vsel %vm586_vm4, %v545_v15, %v619_v19  ;;  %668 = vst.msk [vmem:[%s990_s9 + $0x68] sm:$0xff] %vm654_vm2, %v635_v23 }
 0x10a   : > { %684 = vst.msk [vmem:[%s990_s9 + $0xe8] sm:$0xff] %vm654_vm2, %v651_v24 }
 0x10b PF: > { %s15_s17 = sadd.s32 1, %s888_s17  }
 0x10c   : > { %p12_p4 = scmp.ge.s32.totalorder %s15_s17, 4  }
 0x10e   :  { %14 = sbr.rel (!%p12_p4) target bundleno = 2 (0x2), region = 66 }

</bundles_post_ra>
